<compile_context>
chip_gen: v6e
topology: v6e:2x2x1
jax: 0.10.0
libtpu: 0.0.40
codegen_flags: <defaults>
</compile_context>

<pallas_src>
import jax
import jax.numpy as jnp
import numpy as np
from jax.experimental import pallas as pl
from jax.experimental.pallas import tpu as pltpu

# ---- model config (small, consistent with ModelArgs) ----
D_MODEL = 32
EXPAND = 2
D_INNER = EXPAND * D_MODEL          # 64
D_STATE = 16
DT_RANK = -(-D_MODEL // 16)         # ceil(d_model/16) = 2
D_CONV = 4
BATCH = 2
SEQ = 8


def mamba_block_kernel(x_ref, w_in_ref, conv_w_ref, conv_b_ref,
                       xproj_f_ref, dtb_ref, a_t_ref, d_ref, w_out_ref,
                       out_ref, dA_scr, dBu_scr, h_scr):
    L = h_scr.shape[0]              # sequence length
    B = h_scr.shape[1]              # batch
    T = x_ref.shape[0]              # B * L rows, batch-major collapsed

    x = x_ref[...]                                           # (T, d_model)

    # ---- in_proj over all batch rows at once (single MXU matmul) ----
    xr = jnp.dot(x, w_in_ref[...], preferred_element_type=jnp.float32)  # (T, 2*di)
    xin = xr[:, :D_INNER]
    res = xr[:, D_INNER:]

    # ---- depthwise causal conv1d (padding = d_conv - 1, truncated to L) ----
    # pltpu.roll rotates the collapsed (T, d_inner) tile along sublanes (XLU);
    # the iota mask zeroes rows whose within-sequence position is < shift,
    # which implements the causal left-pad AND prevents cross-batch leakage.
    pos = jax.lax.broadcasted_iota(jnp.int32, (T, D_INNER), 0) % L
    conv = conv_b_ref[0:1, :] + conv_w_ref[D_CONV - 1:D_CONV, :] * xin
    for k in range(D_CONV - 1):
        shift = D_CONV - 1 - k                                # 3, 2, 1
        rolled = pltpu.roll(xin, shift, axis=0)               # rolled[r] = xin[r-shift]
        conv = conv + conv_w_ref[k:k + 1, :] * jnp.where(pos >= shift, rolled, 0.0)
    xc = conv * jax.nn.sigmoid(conv)                          # SiLU, (T, d_inner)

    # ---- x_proj (dt_proj pre-fused on host, zero-padded to 128 lanes) ----
    x_dbl = jnp.dot(xc, xproj_f_ref[...], preferred_element_type=jnp.float32)  # (T, 128)
    delta = jax.nn.softplus(x_dbl[:, :D_INNER] + dtb_ref[0:1, :])   # (T, d_inner)
    Bm = x_dbl[:, D_INNER:D_INNER + D_STATE]                        # (T, n)
    Cm = x_dbl[:, D_INNER + D_STATE:D_INNER + 2 * D_STATE]          # (T, n)

    # ---- discretize into VMEM scratch, laid out (t, b, n, d_inner) ----
    # Per-batch static-slice fill: only one (L, n, d_inner) value is live at a
    # time; the scan reloads one (B, n, d_inner) slab per step.
    a_t = a_t_ref[...]                                        # (n, d_inner) = -exp(A_log).T
    du = delta * xc                                           # (T, d_inner)
    for b in range(B):
        rows = slice(b * L, (b + 1) * L)
        dA_scr[:, b] = jnp.exp(delta[rows, :][:, None, :] * a_t[None, :, :])
        dBu_scr[:, b] = Bm[rows, :][:, :, None] * du[rows, :][:, None, :]

    # ---- serial selective scan: both batches per step; history -> h_scr ----
    # Pure VPU mul-add recurrence; only h is carried in vregs.
    def step(t, h):
        h = dA_scr[t] * h + dBu_scr[t]                        # (B, n, d_inner)
        h_scr[t] = h
        return h

    jax.lax.fori_loop(0, L, step,
                      jnp.zeros((B, D_STATE, D_INNER), jnp.float32),
                      unroll=True)

    # ---- bulk C.h contraction (hoisted out of the serial loop) ----
    y_parts = []
    for b in range(B):
        cb = Cm[b * L:(b + 1) * L, :]                         # (L, n)
        hb = h_scr[:, b]                                      # (L, n, d_inner)
        y_parts.append(jnp.sum(cb[:, :, None] * hb, axis=1))  # (L, d_inner)
    y = jnp.concatenate(y_parts, axis=0)                      # (T, d_inner)

    # ---- D skip, gate with SiLU(res), out_proj; single contiguous store ----
    y = y + xc * d_ref[0:1, :]
    y = y * (res * jax.nn.sigmoid(res))
    out_ref[...] = jnp.dot(y, w_out_ref[...],
                           preferred_element_type=jnp.float32).astype(out_ref.dtype)


def mamba_block(x, params):
    b, l, d = x.shape
    assert (b * l) % 8 == 0, "collapsed B*L rows must be a multiple of 8 sublanes"
    (w_in, conv_w, conv_b, xproj_w, dtproj_w, dtproj_b,
     a_log, d_param, w_out) = params

    # Host-side precompute (plain XLA, exact): fuse dt_proj into x_proj,
    # zero-pad to 128 output lanes (lane-dense x_dbl), pre-negate/exp/transpose A.
    fused = jnp.concatenate(
        [xproj_w[:, :DT_RANK] @ dtproj_w, xproj_w[:, DT_RANK:]], axis=1)  # (di, di+2n)
    pad = (-fused.shape[1]) % 128
    xproj_fused = jnp.pad(fused, ((0, 0), (0, pad)))          # (d_inner, 128)
    a_t = (-jnp.exp(a_log)).T                                 # (n, d_inner)

    x2 = x.reshape(b * l, d)
    out2 = pl.pallas_call(
        mamba_block_kernel,
        out_shape=jax.ShapeDtypeStruct((b * l, d), jnp.float32),
        scratch_shapes=[
            pltpu.VMEM((l, b, D_STATE, D_INNER), jnp.float32),   # dA
            pltpu.VMEM((l, b, D_STATE, D_INNER), jnp.float32),   # dB*u
            pltpu.VMEM((l, b, D_STATE, D_INNER), jnp.float32),   # h history
        ],
    )(x2, w_in, conv_w, conv_b, xproj_fused, dtproj_b, a_t, d_param, w_out)
    return out2.reshape(b, l, d)


def init_params(key):
    """Deterministic synthetic params. PyTorch Linear weights (out,in) are
    stored transposed as (in,out); Conv1d weight (d_inner,1,K) is stored as
    (K, d_inner)."""
    ks = jax.random.split(key, 6)

    def lin(k, fan_in, fan_out):
        bound = 1.0 / np.sqrt(fan_in)
        return jax.random.uniform(k, (fan_in, fan_out), jnp.float32,
                                  minval=-bound, maxval=bound)

    w_in = lin(ks[0], D_MODEL, 2 * D_INNER)                        # (32, 128)
    conv_w = jax.random.uniform(ks[1], (D_CONV, D_INNER), jnp.float32,
                                minval=-0.5, maxval=0.5)           # (4, 64)
    conv_b = jax.random.uniform(ks[2], (1, D_INNER), jnp.float32,
                                minval=-0.1, maxval=0.1)           # (1, 64)
    xproj_w = lin(ks[3], D_INNER, DT_RANK + 2 * D_STATE)           # (64, 34)
    dtproj_w = lin(ks[4], DT_RANK, D_INNER)                        # (2, 64)
    dtproj_b = jax.random.uniform(ks[5], (1, D_INNER), jnp.float32,
                                  minval=-0.1, maxval=0.1)         # (1, 64)
    a_log = jnp.log(jnp.tile(jnp.arange(1, D_STATE + 1,
                                        dtype=jnp.float32),
                             (D_INNER, 1)))                        # (64, 16)
    d_param = jnp.ones((1, D_INNER), jnp.float32)                  # (1, 64)
    w_out = lin(jax.random.fold_in(key, 99), D_INNER, D_MODEL)     # (64, 32)
    return (w_in, conv_w, conv_b, xproj_w, dtproj_w, dtproj_b,
            a_log, d_param, w_out)


def reference(x, params):
    """Pure-JAX reference matching the PyTorch MambaBlock forward semantics."""
    (w_in, conv_w, conv_b, xproj_w, dtproj_w, dtproj_b,
     a_log, d_param, w_out) = params
    b, l, d = x.shape
    xr = x @ w_in
    xin, res = xr[..., :D_INNER], xr[..., D_INNER:]
    # causal depthwise conv1d
    xpad = jnp.pad(xin, ((0, 0), (D_CONV - 1, 0), (0, 0)))
    conv = jnp.zeros_like(xin) + conv_b[0]
    for k in range(D_CONV):
        conv = conv + conv_w[k] * xpad[:, k:k + l, :]
    xc = jax.nn.silu(conv)
    x_dbl = xc @ xproj_w
    delta = x_dbl[..., :DT_RANK]
    Bm = x_dbl[..., DT_RANK:DT_RANK + D_STATE]
    Cm = x_dbl[..., DT_RANK + D_STATE:]
    delta = jax.nn.softplus(delta @ dtproj_w + dtproj_b[0])
    A = -jnp.exp(a_log)
    deltaA = jnp.exp(jnp.einsum('bld,dn->bldn', delta, A))
    deltaB_u = jnp.einsum('bld,bln,bld->bldn', delta, Bm, xc)
    h = jnp.zeros((b, D_INNER, D_STATE), jnp.float32)
    ys = []
    for t in range(l):
        h = deltaA[:, t] * h + deltaB_u[:, t]
        ys.append(jnp.einsum('bdn,bn->bd', h, Cm[:, t, :]))
    y = jnp.stack(ys, axis=1)
    y = y + xc * d_param[0]
    y = y * jax.nn.silu(res)
    return y @ w_out


if __name__ == "__main__":
    key = jax.random.PRNGKey(0)
    kx, kp = jax.random.split(key)
    x = jax.random.normal(kx, (BATCH, SEQ, D_MODEL), jnp.float32)
    params = init_params(kp)

    out = mamba_block(x, params)
    out = jax.block_until_ready(out)

    ref = jax.block_until_ready(reference(x, params))
    assert out.shape == (BATCH, SEQ, D_MODEL)
    assert bool(jnp.all(jnp.isfinite(out)))
    np.testing.assert_allclose(np.asarray(out), np.asarray(ref),
                               rtol=1e-2, atol=1e-2)
    print("KERNEL_OK")
</pallas_src>

<mosaic_0001>
module attributes {stable_mosaic.version = 11 : i64} {
  func.func @mamba_block_kernel(%arg0: memref<16x32xf32, #tpu.memory_space<vmem>>, %arg1: memref<32x128xf32, #tpu.memory_space<vmem>>, %arg2: memref<4x64xf32, #tpu.memory_space<vmem>>, %arg3: memref<1x64xf32, #tpu.memory_space<vmem>>, %arg4: memref<64x128xf32, #tpu.memory_space<vmem>>, %arg5: memref<1x64xf32, #tpu.memory_space<vmem>>, %arg6: memref<16x64xf32, #tpu.memory_space<vmem>>, %arg7: memref<1x64xf32, #tpu.memory_space<vmem>>, %arg8: memref<64x32xf32, #tpu.memory_space<vmem>>, %arg9: memref<16x32xf32, #tpu.memory_space<vmem>>, %arg10: memref<8x2x16x64xf32, #tpu.memory_space<vmem>>, %arg11: memref<8x2x16x64xf32, #tpu.memory_space<vmem>>, %arg12: memref<8x2x16x64xf32, #tpu.memory_space<vmem>>) attributes {dimension_semantics = [], scalar_prefetch = 0 : i64, scratch_operands = 3 : i64, tpu.core_type = #tpu.core_type<tc>} {
    %c0 = arith.constant 0 : index
    %c0_0 = arith.constant 0 : index
    %0 = vector.load %arg0[%c0, %c0_0] : memref<16x32xf32, #tpu.memory_space<vmem>>, vector<16x32xf32>
    %c0_1 = arith.constant 0 : index
    %c0_2 = arith.constant 0 : index
    %1 = vector.load %arg1[%c0_1, %c0_2] : memref<32x128xf32, #tpu.memory_space<vmem>>, vector<32x128xf32>
    %cst = arith.constant dense<0.000000e+00> : vector<16x128xf32>
    %2 = tpu.matmul %0, %1, %cst {dimension_numbers = #tpu.dot_dimension_numbers<[1], [0], [0], [1], [0, 0, 1, 1], [], []>} : vector<16x32xf32>, vector<32x128xf32>, vector<16x128xf32> -> vector<16x128xf32>
    %3 = vector.extract_strided_slice %2 {offsets = [0, 0], sizes = [16, 64], strides = [1, 1]} : vector<16x128xf32> to vector<16x64xf32>
    %4 = vector.extract_strided_slice %2 {offsets = [0, 64], sizes = [16, 64], strides = [1, 1]} : vector<16x128xf32> to vector<16x64xf32>
    %5 = tpu.iota {dimensions = array<i32: 0>} : vector<16x64xi32>
    %c8_i32 = arith.constant 8 : i32
    %c0_i32 = arith.constant 0 : i32
    %6 = arith.cmpi eq, %c8_i32, %c0_i32 : i32
    %c1_i32 = arith.constant 1 : i32
    %7 = arith.select %6, %c1_i32, %c8_i32 : i32
    %8 = vector.broadcast %7 : i32 to vector<16x64xi32>
    %9 = arith.remsi %5, %8 : vector<16x64xi32>
    %c0_i32_3 = arith.constant 0 : i32
    %10 = vector.broadcast %c0_i32_3 : i32 to vector<16x64xi32>
    %11 = arith.cmpi ne, %9, %10 : vector<16x64xi32>
    %c0_i32_4 = arith.constant 0 : i32
    %12 = vector.broadcast %c0_i32_4 : i32 to vector<16x64xi32>
    %13 = arith.cmpi slt, %9, %12 : vector<16x64xi32>
    %c0_i32_5 = arith.constant 0 : i32
    %14 = arith.cmpi slt, %7, %c0_i32_5 : i32
    %15 = vector.broadcast %14 : i1 to vector<16x64xi1>
    %16 = vector.broadcast %15 : vector<16x64xi1> to vector<16x64xi1>
    %17 = arith.xori %13, %16 : vector<16x64xi1>
    %18 = arith.andi %17, %11 : vector<16x64xi1>
    %19 = vector.broadcast %7 : i32 to vector<16x64xi32>
    %20 = arith.addi %9, %19 : vector<16x64xi32>
    %21 = arith.select %18, %20, %9 : vector<16x64xi1>, vector<16x64xi32>
    %c0_6 = arith.constant 0 : index
    %c0_7 = arith.constant 0 : index
    %22 = vector.load %arg3[%c0_6, %c0_7] : memref<1x64xf32, #tpu.memory_space<vmem>>, vector<1x64xf32>
    %c3 = arith.constant 3 : index
    %c0_8 = arith.constant 0 : index
    %23 = vector.load %arg2[%c3, %c0_8] : memref<4x64xf32, #tpu.memory_space<vmem>>, vector<1x64xf32>
    %24 = vector.broadcast %23 : vector<1x64xf32> to vector<16x64xf32>
    %25 = arith.mulf %24, %3 : vector<16x64xf32>
    %26 = vector.broadcast %22 : vector<1x64xf32> to vector<16x64xf32>
    %27 = arith.addf %26, %25 : vector<16x64xf32>
    %c3_i32 = arith.constant 3 : i32
    %28 = tpu.dynamic_rotate %3 by %c3_i32 dim 0 : vector<16x64xf32>, i32 -> vector<16x64xf32>
    %c0_9 = arith.constant 0 : index
    %c0_10 = arith.constant 0 : index
    %29 = vector.load %arg2[%c0_9, %c0_10] : memref<4x64xf32, #tpu.memory_space<vmem>>, vector<1x64xf32>
    %c3_i32_11 = arith.constant 3 : i32
    %30 = vector.broadcast %c3_i32_11 : i32 to vector<16x64xi32>
    %31 = arith.cmpi sge, %21, %30 : vector<16x64xi32>
    %cst_12 = arith.constant 0.000000e+00 : f32
    %32 = vector.broadcast %cst_12 : f32 to vector<16x64xf32>
    %33 = arith.select %31, %28, %32 : vector<16x64xi1>, vector<16x64xf32>
    %34 = vector.broadcast %29 : vector<1x64xf32> to vector<16x64xf32>
    %35 = arith.mulf %34, %33 : vector<16x64xf32>
    %36 = arith.addf %27, %35 : vector<16x64xf32>
    %c2_i32 = arith.constant 2 : i32
    %37 = tpu.dynamic_rotate %3 by %c2_i32 dim 0 : vector<16x64xf32>, i32 -> vector<16x64xf32>
    %c1 = arith.constant 1 : index
    %c0_13 = arith.constant 0 : index
    %38 = vector.load %arg2[%c1, %c0_13] : memref<4x64xf32, #tpu.memory_space<vmem>>, vector<1x64xf32>
    %c2_i32_14 = arith.constant 2 : i32
    %39 = vector.broadcast %c2_i32_14 : i32 to vector<16x64xi32>
    %40 = arith.cmpi sge, %21, %39 : vector<16x64xi32>
    %cst_15 = arith.constant 0.000000e+00 : f32
    %41 = vector.broadcast %cst_15 : f32 to vector<16x64xf32>
    %42 = arith.select %40, %37, %41 : vector<16x64xi1>, vector<16x64xf32>
    %43 = vector.broadcast %38 : vector<1x64xf32> to vector<16x64xf32>
    %44 = arith.mulf %43, %42 : vector<16x64xf32>
    %45 = arith.addf %36, %44 : vector<16x64xf32>
    %c1_i32_16 = arith.constant 1 : i32
    %46 = tpu.dynamic_rotate %3 by %c1_i32_16 dim 0 : vector<16x64xf32>, i32 -> vector<16x64xf32>
    %c2 = arith.constant 2 : index
    %c0_17 = arith.constant 0 : index
    %47 = vector.load %arg2[%c2, %c0_17] : memref<4x64xf32, #tpu.memory_space<vmem>>, vector<1x64xf32>
    %c1_i32_18 = arith.constant 1 : i32
    %48 = vector.broadcast %c1_i32_18 : i32 to vector<16x64xi32>
    %49 = arith.cmpi sge, %21, %48 : vector<16x64xi32>
    %cst_19 = arith.constant 0.000000e+00 : f32
    %50 = vector.broadcast %cst_19 : f32 to vector<16x64xf32>
    %51 = arith.select %49, %46, %50 : vector<16x64xi1>, vector<16x64xf32>
    %52 = vector.broadcast %47 : vector<1x64xf32> to vector<16x64xf32>
    %53 = arith.mulf %52, %51 : vector<16x64xf32>
    %54 = arith.addf %45, %53 : vector<16x64xf32>
    %55 = arith.negf %54 : vector<16x64xf32>
    %56 = math.exp %55 : vector<16x64xf32>
    %cst_20 = arith.constant 1.000000e+00 : f32
    %57 = vector.broadcast %cst_20 : f32 to vector<16x64xf32>
    %58 = arith.addf %57, %56 : vector<16x64xf32>
    %59 = arith.divf %57, %58 : vector<16x64xf32>
    %60 = arith.mulf %54, %59 : vector<16x64xf32>
    %c0_21 = arith.constant 0 : index
    %c0_22 = arith.constant 0 : index
    %61 = vector.load %arg4[%c0_21, %c0_22] : memref<64x128xf32, #tpu.memory_space<vmem>>, vector<64x128xf32>
    %cst_23 = arith.constant dense<0.000000e+00> : vector<16x128xf32>
    %62 = tpu.matmul %60, %61, %cst_23 {dimension_numbers = #tpu.dot_dimension_numbers<[1], [0], [0], [1], [0, 0, 1, 1], [], []>} : vector<16x64xf32>, vector<64x128xf32>, vector<16x128xf32> -> vector<16x128xf32>
    %63 = vector.extract_strided_slice %62 {offsets = [0, 0], sizes = [16, 64], strides = [1, 1]} : vector<16x128xf32> to vector<16x64xf32>
    %c0_24 = arith.constant 0 : index
    %c0_25 = arith.constant 0 : index
    %64 = vector.load %arg5[%c0_24, %c0_25] : memref<1x64xf32, #tpu.memory_space<vmem>>, vector<1x64xf32>
    %65 = vector.broadcast %64 : vector<1x64xf32> to vector<16x64xf32>
    %66 = arith.addf %63, %65 : vector<16x64xf32>
    %cst_26 = arith.constant 0.000000e+00 : f32
    %67 = vector.broadcast %cst_26 : f32 to vector<16x64xf32>
    %68 = arith.maximumf %66, %67 : vector<16x64xf32>
    %69 = vector.broadcast %cst_26 : f32 to vector<16x64xf32>
    %70 = arith.subf %66, %69 : vector<16x64xf32>
    %71 = arith.cmpf one, %70, %70 : vector<16x64xf32>
    %72 = vector.broadcast %cst_26 : f32 to vector<16x64xf32>
    %73 = arith.addf %66, %72 : vector<16x64xf32>
    %74 = math.absf %70 : vector<16x64xf32>
    %cst_27 = arith.constant 0.000000e+00 : f32
    %75 = vector.broadcast %cst_27 : f32 to vector<16x64xf32>
    %76 = arith.subf %75, %74 : vector<16x64xf32>
    %77 = math.exp %76 : vector<16x64xf32>
    %78 = math.log1p %77 : vector<16x64xf32>
    %79 = arith.addf %68, %78 : vector<16x64xf32>
    %80 = arith.select %71, %73, %79 : vector<16x64xi1>, vector<16x64xf32>
    %81 = vector.extract_strided_slice %62 {offsets = [0, 64], sizes = [16, 16], strides = [1, 1]} : vector<16x128xf32> to vector<16x16xf32>
    %82 = vector.extract_strided_slice %62 {offsets = [0, 80], sizes = [16, 16], strides = [1, 1]} : vector<16x128xf32> to vector<16x16xf32>
    %c0_28 = arith.constant 0 : index
    %c0_29 = arith.constant 0 : index
    %83 = vector.load %arg6[%c0_28, %c0_29] : memref<16x64xf32, #tpu.memory_space<vmem>>, vector<16x64xf32>
    %84 = arith.mulf %80, %60 : vector<16x64xf32>
    %85 = vector.extract_strided_slice %80 {offsets = [0, 0], sizes = [8, 64], strides = [1, 1]} : vector<16x64xf32> to vector<8x64xf32>
    %86 = vector.shape_cast %85 : vector<8x64xf32> to vector<8x1x64xf32>
    %87 = vector.shape_cast %83 : vector<16x64xf32> to vector<1x16x64xf32>
    %88 = vector.broadcast %86 : vector<8x1x64xf32> to vector<8x16x64xf32>
    %89 = vector.broadcast %87 : vector<1x16x64xf32> to vector<8x16x64xf32>
    %90 = arith.mulf %88, %89 : vector<8x16x64xf32>
    %91 = math.exp %90 : vector<8x16x64xf32>
    %c0_30 = arith.constant 0 : index
    %c0_31 = arith.constant 0 : index
    %c0_32 = arith.constant 0 : index
    %c0_33 = arith.constant 0 : index
    %92 = vector.load %arg10[%c0_30, %c0_31, %c0_32, %c0_33] : memref<8x2x16x64xf32, #tpu.memory_space<vmem>>, vector<8x1x16x64xf32>
    %93 = vector.shape_cast %92 : vector<8x1x16x64xf32> to vector<8x16x64xf32>
    %94 = vector.shape_cast %91 : vector<8x16x64xf32> to vector<8x1x16x64xf32>
    tpu.vector_store %arg10[%c0_30, %c0_31, %c0_32, %c0_33], %94 {strides = array<i32>} : memref<8x2x16x64xf32, #tpu.memory_space<vmem>>, vector<8x1x16x64xf32>,
    %95 = vector.extract_strided_slice %81 {offsets = [0, 0], sizes = [8, 16], strides = [1, 1]} : vector<16x16xf32> to vector<8x16xf32>
    %96 = vector.shape_cast %95 : vector<8x16xf32> to vector<8x16x1xf32>
    %97 = vector.extract_strided_slice %84 {offsets = [0, 0], sizes = [8, 64], strides = [1, 1]} : vector<16x64xf32> to vector<8x64xf32>
    %98 = vector.shape_cast %97 : vector<8x64xf32> to vector<8x1x64xf32>
    %99 = vector.broadcast %96 : vector<8x16x1xf32> to vector<8x16x64xf32>
    %100 = vector.broadcast %98 : vector<8x1x64xf32> to vector<8x16x64xf32>
    %101 = arith.mulf %99, %100 : vector<8x16x64xf32>
    %c0_34 = arith.constant 0 : index
    %c0_35 = arith.constant 0 : index
    %c0_36 = arith.constant 0 : index
    %c0_37 = arith.constant 0 : index
    %102 = vector.load %arg11[%c0_34, %c0_35, %c0_36, %c0_37] : memref<8x2x16x64xf32, #tpu.memory_space<vmem>>, vector<8x1x16x64xf32>
    %103 = vector.shape_cast %102 : vector<8x1x16x64xf32> to vector<8x16x64xf32>
    %104 = vector.shape_cast %101 : vector<8x16x64xf32> to vector<8x1x16x64xf32>
    tpu.vector_store %arg11[%c0_34, %c0_35, %c0_36, %c0_37], %104 {strides = array<i32>} : memref<8x2x16x64xf32, #tpu.memory_space<vmem>>, vector<8x1x16x64xf32>,
    %105 = vector.extract_strided_slice %80 {offsets = [8, 0], sizes = [8, 64], strides = [1, 1]} : vector<16x64xf32> to vector<8x64xf32>
    %106 = vector.shape_cast %105 : vector<8x64xf32> to vector<8x1x64xf32>
    %107 = vector.shape_cast %83 : vector<16x64xf32> to vector<1x16x64xf32>
    %108 = vector.broadcast %106 : vector<8x1x64xf32> to vector<8x16x64xf32>
    %109 = vector.broadcast %107 : vector<1x16x64xf32> to vector<8x16x64xf32>
    %110 = arith.mulf %108, %109 : vector<8x16x64xf32>
    %111 = math.exp %110 : vector<8x16x64xf32>
    %c0_38 = arith.constant 0 : index
    %c1_39 = arith.constant 1 : index
    %c0_40 = arith.constant 0 : index
    %c0_41 = arith.constant 0 : index
    %112 = vector.load %arg10[%c0_38, %c1_39, %c0_40, %c0_41] : memref<8x2x16x64xf32, #tpu.memory_space<vmem>>, vector<8x1x16x64xf32>
    %113 = vector.shape_cast %112 : vector<8x1x16x64xf32> to vector<8x16x64xf32>
    %114 = vector.shape_cast %111 : vector<8x16x64xf32> to vector<8x1x16x64xf32>
    tpu.vector_store %arg10[%c0_38, %c1_39, %c0_40, %c0_41], %114 {strides = array<i32>} : memref<8x2x16x64xf32, #tpu.memory_space<vmem>>, vector<8x1x16x64xf32>,
    %115 = vector.extract_strided_slice %81 {offsets = [8, 0], sizes = [8, 16], strides = [1, 1]} : vector<16x16xf32> to vector<8x16xf32>
    %116 = vector.shape_cast %115 : vector<8x16xf32> to vector<8x16x1xf32>
    %117 = vector.extract_strided_slice %84 {offsets = [8, 0], sizes = [8, 64], strides = [1, 1]} : vector<16x64xf32> to vector<8x64xf32>
    %118 = vector.shape_cast %117 : vector<8x64xf32> to vector<8x1x64xf32>
    %119 = vector.broadcast %116 : vector<8x16x1xf32> to vector<8x16x64xf32>
    %120 = vector.broadcast %118 : vector<8x1x64xf32> to vector<8x16x64xf32>
    %121 = arith.mulf %119, %120 : vector<8x16x64xf32>
    %c0_42 = arith.constant 0 : index
    %c1_43 = arith.constant 1 : index
    %c0_44 = arith.constant 0 : index
    %c0_45 = arith.constant 0 : index
    %122 = vector.load %arg11[%c0_42, %c1_43, %c0_44, %c0_45] : memref<8x2x16x64xf32, #tpu.memory_space<vmem>>, vector<8x1x16x64xf32>
    %123 = vector.shape_cast %122 : vector<8x1x16x64xf32> to vector<8x16x64xf32>
    %124 = vector.shape_cast %121 : vector<8x16x64xf32> to vector<8x1x16x64xf32>
    tpu.vector_store %arg11[%c0_42, %c1_43, %c0_44, %c0_45], %124 {strides = array<i32>} : memref<8x2x16x64xf32, #tpu.memory_space<vmem>>, vector<8x1x16x64xf32>,
    %cst_46 = arith.constant 0.000000e+00 : f32
    %125 = vector.broadcast %cst_46 : f32 to vector<2x16x64xf32>
    %c0_i32_47 = arith.constant 0 : i32
    %126 = arith.index_cast %c0_i32_47 : i32 to index
    %c0_48 = arith.constant 0 : index
    %c0_49 = arith.constant 0 : index
    %c0_50 = arith.constant 0 : index
    %127 = vector.load %arg10[%126, %c0_48, %c0_49, %c0_50] : memref<8x2x16x64xf32, #tpu.memory_space<vmem>>, vector<1x2x16x64xf32>
    %128 = vector.shape_cast %127 : vector<1x2x16x64xf32> to vector<2x16x64xf32>
    %129 = arith.mulf %128, %125 : vector<2x16x64xf32>
    %130 = arith.index_cast %c0_i32_47 : i32 to index
    %c0_51 = arith.constant 0 : index
    %c0_52 = arith.constant 0 : index
    %c0_53 = arith.constant 0 : index
    %131 = vector.load %arg11[%130, %c0_51, %c0_52, %c0_53] : memref<8x2x16x64xf32, #tpu.memory_space<vmem>>, vector<1x2x16x64xf32>
    %132 = vector.shape_cast %131 : vector<1x2x16x64xf32> to vector<2x16x64xf32>
    %133 = arith.addf %129, %132 : vector<2x16x64xf32>
    %134 = arith.index_cast %c0_i32_47 : i32 to index
    %c0_54 = arith.constant 0 : index
    %c0_55 = arith.constant 0 : index
    %c0_56 = arith.constant 0 : index
    %135 = vector.load %arg12[%134, %c0_54, %c0_55, %c0_56] : memref<8x2x16x64xf32, #tpu.memory_space<vmem>>, vector<1x2x16x64xf32>
    %136 = vector.shape_cast %135 : vector<1x2x16x64xf32> to vector<2x16x64xf32>
    %137 = vector.shape_cast %133 : vector<2x16x64xf32> to vector<1x2x16x64xf32>
    tpu.vector_store %arg12[%134, %c0_54, %c0_55, %c0_56], %137 {strides = array<i32>} : memref<8x2x16x64xf32, #tpu.memory_space<vmem>>, vector<1x2x16x64xf32>,
    %c1_i32_57 = arith.constant 1 : i32
    %138 = arith.index_cast %c1_i32_57 : i32 to index
    %c0_58 = arith.constant 0 : index
    %c0_59 = arith.constant 0 : index
    %c0_60 = arith.constant 0 : index
    %139 = vector.load %arg10[%138, %c0_58, %c0_59, %c0_60] : memref<8x2x16x64xf32, #tpu.memory_space<vmem>>, vector<1x2x16x64xf32>
    %140 = vector.shape_cast %139 : vector<1x2x16x64xf32> to vector<2x16x64xf32>
    %141 = arith.mulf %140, %133 : vector<2x16x64xf32>
    %142 = arith.index_cast %c1_i32_57 : i32 to index
    %c0_61 = arith.constant 0 : index
    %c0_62 = arith.constant 0 : index
    %c0_63 = arith.constant 0 : index
    %143 = vector.load %arg11[%142, %c0_61, %c0_62, %c0_63] : memref<8x2x16x64xf32, #tpu.memory_space<vmem>>, vector<1x2x16x64xf32>
    %144 = vector.shape_cast %143 : vector<1x2x16x64xf32> to vector<2x16x64xf32>
    %145 = arith.addf %141, %144 : vector<2x16x64xf32>
    %146 = arith.index_cast %c1_i32_57 : i32 to index
    %c0_64 = arith.constant 0 : index
    %c0_65 = arith.constant 0 : index
    %c0_66 = arith.constant 0 : index
    %147 = vector.load %arg12[%146, %c0_64, %c0_65, %c0_66] : memref<8x2x16x64xf32, #tpu.memory_space<vmem>>, vector<1x2x16x64xf32>
    %148 = vector.shape_cast %147 : vector<1x2x16x64xf32> to vector<2x16x64xf32>
    %149 = vector.shape_cast %145 : vector<2x16x64xf32> to vector<1x2x16x64xf32>
    tpu.vector_store %arg12[%146, %c0_64, %c0_65, %c0_66], %149 {strides = array<i32>} : memref<8x2x16x64xf32, #tpu.memory_space<vmem>>, vector<1x2x16x64xf32>,
    %c2_i32_67 = arith.constant 2 : i32
    %150 = arith.index_cast %c2_i32_67 : i32 to index
    %c0_68 = arith.constant 0 : index
    %c0_69 = arith.constant 0 : index
    %c0_70 = arith.constant 0 : index
    %151 = vector.load %arg10[%150, %c0_68, %c0_69, %c0_70] : memref<8x2x16x64xf32, #tpu.memory_space<vmem>>, vector<1x2x16x64xf32>
    %152 = vector.shape_cast %151 : vector<1x2x16x64xf32> to vector<2x16x64xf32>
    %153 = arith.mulf %152, %145 : vector<2x16x64xf32>
    %154 = arith.index_cast %c2_i32_67 : i32 to index
    %c0_71 = arith.constant 0 : index
    %c0_72 = arith.constant 0 : index
    %c0_73 = arith.constant 0 : index
    %155 = vector.load %arg11[%154, %c0_71, %c0_72, %c0_73] : memref<8x2x16x64xf32, #tpu.memory_space<vmem>>, vector<1x2x16x64xf32>
    %156 = vector.shape_cast %155 : vector<1x2x16x64xf32> to vector<2x16x64xf32>
    %157 = arith.addf %153, %156 : vector<2x16x64xf32>
    %158 = arith.index_cast %c2_i32_67 : i32 to index
    %c0_74 = arith.constant 0 : index
    %c0_75 = arith.constant 0 : index
    %c0_76 = arith.constant 0 : index
    %159 = vector.load %arg12[%158, %c0_74, %c0_75, %c0_76] : memref<8x2x16x64xf32, #tpu.memory_space<vmem>>, vector<1x2x16x64xf32>
    %160 = vector.shape_cast %159 : vector<1x2x16x64xf32> to vector<2x16x64xf32>
    %161 = vector.shape_cast %157 : vector<2x16x64xf32> to vector<1x2x16x64xf32>
    tpu.vector_store %arg12[%158, %c0_74, %c0_75, %c0_76], %161 {strides = array<i32>} : memref<8x2x16x64xf32, #tpu.memory_space<vmem>>, vector<1x2x16x64xf32>,
    %c3_i32_77 = arith.constant 3 : i32
    %162 = arith.index_cast %c3_i32_77 : i32 to index
    %c0_78 = arith.constant 0 : index
    %c0_79 = arith.constant 0 : index
    %c0_80 = arith.constant 0 : index
    %163 = vector.load %arg10[%162, %c0_78, %c0_79, %c0_80] : memref<8x2x16x64xf32, #tpu.memory_space<vmem>>, vector<1x2x16x64xf32>
    %164 = vector.shape_cast %163 : vector<1x2x16x64xf32> to vector<2x16x64xf32>
    %165 = arith.mulf %164, %157 : vector<2x16x64xf32>
    %166 = arith.index_cast %c3_i32_77 : i32 to index
    %c0_81 = arith.constant 0 : index
    %c0_82 = arith.constant 0 : index
    %c0_83 = arith.constant 0 : index
    %167 = vector.load %arg11[%166, %c0_81, %c0_82, %c0_83] : memref<8x2x16x64xf32, #tpu.memory_space<vmem>>, vector<1x2x16x64xf32>
    %168 = vector.shape_cast %167 : vector<1x2x16x64xf32> to vector<2x16x64xf32>
    %169 = arith.addf %165, %168 : vector<2x16x64xf32>
    %170 = arith.index_cast %c3_i32_77 : i32 to index
    %c0_84 = arith.constant 0 : index
    %c0_85 = arith.constant 0 : index
    %c0_86 = arith.constant 0 : index
    %171 = vector.load %arg12[%170, %c0_84, %c0_85, %c0_86] : memref<8x2x16x64xf32, #tpu.memory_space<vmem>>, vector<1x2x16x64xf32>
    %172 = vector.shape_cast %171 : vector<1x2x16x64xf32> to vector<2x16x64xf32>
    %173 = vector.shape_cast %169 : vector<2x16x64xf32> to vector<1x2x16x64xf32>
    tpu.vector_store %arg12[%170, %c0_84, %c0_85, %c0_86], %173 {strides = array<i32>} : memref<8x2x16x64xf32, #tpu.memory_space<vmem>>, vector<1x2x16x64xf32>,
    %c4_i32 = arith.constant 4 : i32
    %174 = arith.index_cast %c4_i32 : i32 to index
    %c0_87 = arith.constant 0 : index
    %c0_88 = arith.constant 0 : index
    %c0_89 = arith.constant 0 : index
    %175 = vector.load %arg10[%174, %c0_87, %c0_88, %c0_89] : memref<8x2x16x64xf32, #tpu.memory_space<vmem>>, vector<1x2x16x64xf32>
    %176 = vector.shape_cast %175 : vector<1x2x16x64xf32> to vector<2x16x64xf32>
    %177 = arith.mulf %176, %169 : vector<2x16x64xf32>
    %178 = arith.index_cast %c4_i32 : i32 to index
    %c0_90 = arith.constant 0 : index
    %c0_91 = arith.constant 0 : index
    %c0_92 = arith.constant 0 : index
    %179 = vector.load %arg11[%178, %c0_90, %c0_91, %c0_92] : memref<8x2x16x64xf32, #tpu.memory_space<vmem>>, vector<1x2x16x64xf32>
    %180 = vector.shape_cast %179 : vector<1x2x16x64xf32> to vector<2x16x64xf32>
    %181 = arith.addf %177, %180 : vector<2x16x64xf32>
    %182 = arith.index_cast %c4_i32 : i32 to index
    %c0_93 = arith.constant 0 : index
    %c0_94 = arith.constant 0 : index
    %c0_95 = arith.constant 0 : index
    %183 = vector.load %arg12[%182, %c0_93, %c0_94, %c0_95] : memref<8x2x16x64xf32, #tpu.memory_space<vmem>>, vector<1x2x16x64xf32>
    %184 = vector.shape_cast %183 : vector<1x2x16x64xf32> to vector<2x16x64xf32>
    %185 = vector.shape_cast %181 : vector<2x16x64xf32> to vector<1x2x16x64xf32>
    tpu.vector_store %arg12[%182, %c0_93, %c0_94, %c0_95], %185 {strides = array<i32>} : memref<8x2x16x64xf32, #tpu.memory_space<vmem>>, vector<1x2x16x64xf32>,
    %c5_i32 = arith.constant 5 : i32
    %186 = arith.index_cast %c5_i32 : i32 to index
    %c0_96 = arith.constant 0 : index
    %c0_97 = arith.constant 0 : index
    %c0_98 = arith.constant 0 : index
    %187 = vector.load %arg10[%186, %c0_96, %c0_97, %c0_98] : memref<8x2x16x64xf32, #tpu.memory_space<vmem>>, vector<1x2x16x64xf32>
    %188 = vector.shape_cast %187 : vector<1x2x16x64xf32> to vector<2x16x64xf32>
    %189 = arith.mulf %188, %181 : vector<2x16x64xf32>
    %190 = arith.index_cast %c5_i32 : i32 to index
    %c0_99 = arith.constant 0 : index
    %c0_100 = arith.constant 0 : index
    %c0_101 = arith.constant 0 : index
    %191 = vector.load %arg11[%190, %c0_99, %c0_100, %c0_101] : memref<8x2x16x64xf32, #tpu.memory_space<vmem>>, vector<1x2x16x64xf32>
    %192 = vector.shape_cast %191 : vector<1x2x16x64xf32> to vector<2x16x64xf32>
    %193 = arith.addf %189, %192 : vector<2x16x64xf32>
    %194 = arith.index_cast %c5_i32 : i32 to index
    %c0_102 = arith.constant 0 : index
    %c0_103 = arith.constant 0 : index
    %c0_104 = arith.constant 0 : index
    %195 = vector.load %arg12[%194, %c0_102, %c0_103, %c0_104] : memref<8x2x16x64xf32, #tpu.memory_space<vmem>>, vector<1x2x16x64xf32>
    %196 = vector.shape_cast %195 : vector<1x2x16x64xf32> to vector<2x16x64xf32>
    %197 = vector.shape_cast %193 : vector<2x16x64xf32> to vector<1x2x16x64xf32>
    tpu.vector_store %arg12[%194, %c0_102, %c0_103, %c0_104], %197 {strides = array<i32>} : memref<8x2x16x64xf32, #tpu.memory_space<vmem>>, vector<1x2x16x64xf32>,
    %c6_i32 = arith.constant 6 : i32
    %198 = arith.index_cast %c6_i32 : i32 to index
    %c0_105 = arith.constant 0 : index
    %c0_106 = arith.constant 0 : index
    %c0_107 = arith.constant 0 : index
    %199 = vector.load %arg10[%198, %c0_105, %c0_106, %c0_107] : memref<8x2x16x64xf32, #tpu.memory_space<vmem>>, vector<1x2x16x64xf32>
    %200 = vector.shape_cast %199 : vector<1x2x16x64xf32> to vector<2x16x64xf32>
    %201 = arith.mulf %200, %193 : vector<2x16x64xf32>
    %202 = arith.index_cast %c6_i32 : i32 to index
    %c0_108 = arith.constant 0 : index
    %c0_109 = arith.constant 0 : index
    %c0_110 = arith.constant 0 : index
    %203 = vector.load %arg11[%202, %c0_108, %c0_109, %c0_110] : memref<8x2x16x64xf32, #tpu.memory_space<vmem>>, vector<1x2x16x64xf32>
    %204 = vector.shape_cast %203 : vector<1x2x16x64xf32> to vector<2x16x64xf32>
    %205 = arith.addf %201, %204 : vector<2x16x64xf32>
    %206 = arith.index_cast %c6_i32 : i32 to index
    %c0_111 = arith.constant 0 : index
    %c0_112 = arith.constant 0 : index
    %c0_113 = arith.constant 0 : index
    %207 = vector.load %arg12[%206, %c0_111, %c0_112, %c0_113] : memref<8x2x16x64xf32, #tpu.memory_space<vmem>>, vector<1x2x16x64xf32>
    %208 = vector.shape_cast %207 : vector<1x2x16x64xf32> to vector<2x16x64xf32>
    %209 = vector.shape_cast %205 : vector<2x16x64xf32> to vector<1x2x16x64xf32>
    tpu.vector_store %arg12[%206, %c0_111, %c0_112, %c0_113], %209 {strides = array<i32>} : memref<8x2x16x64xf32, #tpu.memory_space<vmem>>, vector<1x2x16x64xf32>,
    %c7_i32 = arith.constant 7 : i32
    %210 = arith.index_cast %c7_i32 : i32 to index
    %c0_114 = arith.constant 0 : index
    %c0_115 = arith.constant 0 : index
    %c0_116 = arith.constant 0 : index
    %211 = vector.load %arg10[%210, %c0_114, %c0_115, %c0_116] : memref<8x2x16x64xf32, #tpu.memory_space<vmem>>, vector<1x2x16x64xf32>
    %212 = vector.shape_cast %211 : vector<1x2x16x64xf32> to vector<2x16x64xf32>
    %213 = arith.mulf %212, %205 : vector<2x16x64xf32>
    %214 = arith.index_cast %c7_i32 : i32 to index
    %c0_117 = arith.constant 0 : index
    %c0_118 = arith.constant 0 : index
    %c0_119 = arith.constant 0 : index
    %215 = vector.load %arg11[%214, %c0_117, %c0_118, %c0_119] : memref<8x2x16x64xf32, #tpu.memory_space<vmem>>, vector<1x2x16x64xf32>
    %216 = vector.shape_cast %215 : vector<1x2x16x64xf32> to vector<2x16x64xf32>
    %217 = arith.addf %213, %216 : vector<2x16x64xf32>
    %218 = arith.index_cast %c7_i32 : i32 to index
    %c0_120 = arith.constant 0 : index
    %c0_121 = arith.constant 0 : index
    %c0_122 = arith.constant 0 : index
    %219 = vector.load %arg12[%218, %c0_120, %c0_121, %c0_122] : memref<8x2x16x64xf32, #tpu.memory_space<vmem>>, vector<1x2x16x64xf32>
    %220 = vector.shape_cast %219 : vector<1x2x16x64xf32> to vector<2x16x64xf32>
    %221 = vector.shape_cast %217 : vector<2x16x64xf32> to vector<1x2x16x64xf32>
    tpu.vector_store %arg12[%218, %c0_120, %c0_121, %c0_122], %221 {strides = array<i32>} : memref<8x2x16x64xf32, #tpu.memory_space<vmem>>, vector<1x2x16x64xf32>,
    %c8_i32_123 = arith.constant 8 : i32
    %222 = vector.extract_strided_slice %82 {offsets = [0, 0], sizes = [8, 16], strides = [1, 1]} : vector<16x16xf32> to vector<8x16xf32>
    %c0_124 = arith.constant 0 : index
    %c0_125 = arith.constant 0 : index
    %c0_126 = arith.constant 0 : index
    %c0_127 = arith.constant 0 : index
    %223 = vector.load %arg12[%c0_124, %c0_125, %c0_126, %c0_127] : memref<8x2x16x64xf32, #tpu.memory_space<vmem>>, vector<8x1x16x64xf32>
    %224 = vector.shape_cast %223 : vector<8x1x16x64xf32> to vector<8x16x64xf32>
    %225 = vector.shape_cast %222 : vector<8x16xf32> to vector<8x16x1xf32>
    %226 = vector.broadcast %225 : vector<8x16x1xf32> to vector<8x16x64xf32>
    %227 = arith.mulf %226, %224 : vector<8x16x64xf32>
    %cst_128 = arith.constant dense<0.000000e+00> : vector<8x64xf32>
    %228 = vector.multi_reduction <add>, %227, %cst_128 [1] : vector<8x16x64xf32> to vector<8x64xf32>
    %229 = vector.extract_strided_slice %82 {offsets = [8, 0], sizes = [8, 16], strides = [1, 1]} : vector<16x16xf32> to vector<8x16xf32>
    %c0_129 = arith.constant 0 : index
    %c1_130 = arith.constant 1 : index
    %c0_131 = arith.constant 0 : index
    %c0_132 = arith.constant 0 : index
    %230 = vector.load %arg12[%c0_129, %c1_130, %c0_131, %c0_132] : memref<8x2x16x64xf32, #tpu.memory_space<vmem>>, vector<8x1x16x64xf32>
    %231 = vector.shape_cast %230 : vector<8x1x16x64xf32> to vector<8x16x64xf32>
    %232 = vector.shape_cast %229 : vector<8x16xf32> to vector<8x16x1xf32>
    %233 = vector.broadcast %232 : vector<8x16x1xf32> to vector<8x16x64xf32>
    %234 = arith.mulf %233, %231 : vector<8x16x64xf32>
    %cst_133 = arith.constant dense<0.000000e+00> : vector<8x64xf32>
    %235 = vector.multi_reduction <add>, %234, %cst_133 [1] : vector<8x16x64xf32> to vector<8x64xf32>
    %236 = tpu.concatenate %228, %235 in 0 : vector<8x64xf32>, vector<8x64xf32> -> vector<16x64xf32>
    %c0_134 = arith.constant 0 : index
    %c0_135 = arith.constant 0 : index
    %237 = vector.load %arg7[%c0_134, %c0_135] : memref<1x64xf32, #tpu.memory_space<vmem>>, vector<1x64xf32>
    %238 = vector.broadcast %237 : vector<1x64xf32> to vector<16x64xf32>
    %239 = arith.mulf %60, %238 : vector<16x64xf32>
    %240 = arith.addf %236, %239 : vector<16x64xf32>
    %241 = arith.negf %4 : vector<16x64xf32>
    %242 = math.exp %241 : vector<16x64xf32>
    %cst_136 = arith.constant 1.000000e+00 : f32
    %243 = vector.broadcast %cst_136 : f32 to vector<16x64xf32>
    %244 = arith.addf %243, %242 : vector<16x64xf32>
    %245 = arith.divf %243, %244 : vector<16x64xf32>
    %246 = arith.mulf %4, %245 : vector<16x64xf32>
    %247 = arith.mulf %240, %246 : vector<16x64xf32>
    %c0_137 = arith.constant 0 : index
    %c0_138 = arith.constant 0 : index
    %248 = vector.load %arg8[%c0_137, %c0_138] : memref<64x32xf32, #tpu.memory_space<vmem>>, vector<64x32xf32>
    %cst_139 = arith.constant dense<0.000000e+00> : vector<16x32xf32>
    %249 = tpu.matmul %247, %248, %cst_139 {dimension_numbers = #tpu.dot_dimension_numbers<[1], [0], [0], [1], [0, 0, 1, 1], [], []>} : vector<16x64xf32>, vector<64x32xf32>, vector<16x32xf32> -> vector<16x32xf32>
    %c0_140 = arith.constant 0 : index
    %c0_141 = arith.constant 0 : index
    %250 = vector.load %arg9[%c0_140, %c0_141] : memref<16x32xf32, #tpu.memory_space<vmem>>, vector<16x32xf32>
    tpu.vector_store %arg9[%c0_140, %c0_141], %249 {strides = array<i32>} : memref<16x32xf32, #tpu.memory_space<vmem>>, vector<16x32xf32>,
    return
  }
}

</mosaic_0001>

<bundles_post_ra>
// kernel: tpu_custom_call.1
= control target key start
LH: loop header
LB: loop body
LE: loop exit
PB: predicated region body
PF: predicated region fallthrough
CT: control target
= control target key end

     0   :  { %14 = vsyncpa [#allocation6], 0  ;;  %s2729_s0 = inlined_call_operand.hbm [shape: f32[16,32], index: 0, kind: input, shape index: {}]   ;;  %s2730_s1 = inlined_call_operand.vmem [shape: f32[32,128], index: 1, kind: input, shape index: {}]   ;;  %s2731_s2 = inlined_call_operand.vmem [shape: f32[4,64], index: 2, kind: input, shape index: {}]   ;;  %s2732_s3 = inlined_call_operand.vmem [shape: f32[1,64], index: 3, kind: input, shape index: {}]   ;;  %s2733_s4 = inlined_call_operand.vmem [shape: f32[64,128], index: 4, kind: input, shape index: {}]   ;;  %s2734_s5 = inlined_call_operand.vmem [shape: f32[1,64], index: 5, kind: input, shape index: {}]   ;;  %s2735_s6 = inlined_call_operand.hbm [shape: f32[16,64], index: 6, kind: input, shape index: {}]   ;;  %s2736_s7 = inlined_call_operand.vmem [shape: f32[1,64], index: 7, kind: input, shape index: {}]   ;;  %s2737_s8 = inlined_call_operand.vmem [shape: f32[64,32], index: 8, kind: input, shape index: {}]   ;;  %s2738_s9 = inlined_call_operand.hbm [shape: f32[16,32], index: 9, kind: output, shape index: {}]  }
   0x1   :  { %15 = vsyncpa [#allocation9], 0 }
   0x2   :  { %16 = vsyncpa [#allocation7], 0  ;;  %s2099_s30 = smov [#allocation5]  }
   0x3   :  { %s22_s10 = sshll.u32 %s2099_s30, 4  ;;  %s23_s10 = int_to_ptr.vmem [resolvable:$true] %s22_s10 }
   0x4   :  { %s2041_s11 = scalar_lea.vmem %s23_s10, 256  ;;  %p2046_p1 = scmp.lt.s32.totalorder %s23_s10, %s23_s10 }
   0x5   :  { %p2042_p0 = scmp.ne.s32.totalorder %s23_s10, %s2041_s11  ;;  %p2047_p2 = scmp.lt.s32.totalorder %s2041_s11, %s2041_s11 }
   0x7   :  { %p2048_p3 = por %p2047_p2, %p2046_p1 }
   0x9   :  { %p2049_p4 = pnand %p2048_p3, %p2042_p0 }
   0xb   :  { %2052 = shalt.err (!%p2049_p4)
}
   0xc   :  { %s2100_s12 = smov 128   ;;  %s2101_s13 = smov 8  }
   0xd   :  { %28 = dma.hbm_to_vmem [thread:$0]  %s2729_s0, 256, %s23_s10, [#allocation6], %s2100_s12, %s2100_s12, %s2101_s13  }
   0xe   :  { %s2102_s16 = smov [#allocation8]  }
   0xf   :  { %s44_s17 = sshll.u32 %s2102_s16, 4  ;;  %s45_s17 = int_to_ptr.vmem [resolvable:$true] %s44_s17 }
  0x10   :  { %s2061_s18 = scalar_lea.vmem %s45_s17, 256  ;;  %p2066_p6 = scmp.lt.s32.totalorder %s45_s17, %s45_s17 }
  0x11   :  { %p2062_p5 = scmp.ne.s32.totalorder %s45_s17, %s2061_s18  ;;  %p2067_p7 = scmp.lt.s32.totalorder %s2061_s18, %s2061_s18 }
  0x13   :  { %p2068_p8 = por %p2067_p7, %p2066_p6 }
  0x15   :  { %p2069_p9 = pnand %p2068_p8, %p2062_p5 }
  0x17   :  { %2072 = shalt.err (!%p2069_p9)
}
  0x18   :  { %50 = dma.hbm_to_vmem [thread:$0]  %s2735_s6, 256, %s45_s17, [#allocation9], %s2100_s12, %s2100_s12, %s2101_s13  }
  0x19   :  { %2093 = dma.done.wait [#allocation6], 256  }
  0x1a   :  { %2094 = vsyncadd [#allocation6], 4294967040 }
  0x1b   :  { %2095 = dma.done.wait [#allocation9], 256  }
  0x1c   :  { %2096 = vsyncadd [#allocation9], 4294967040  ;;  %vm67_vm0 = vcmask 261120   ;;  %v66_v0 = vld [vmem:[%s2730_s1 + $0x18] sm:$0xff]  ;;  %v65_v1 = vld [vmem:[%s2730_s1 + $0x10] sm:$0xff]  ;;  %v149_v14 = vlaneseq  ;;  %vm268_vm10 = vcmask 523264  }
  0x1d   :  { %1889 = vmatprep.subr.mxu0 %v66_v0  ;;  %v61_v2 = vld [vmem:[#allocation5] sm:$0xff]  ;;  %v64_v3 = vld [vmem:[%s2730_s1 + $0x8] sm:$0xff]  ;;  %v267_v6 = vld [vmem:[%s2733_s4 + $0x38] sm:$0xff]  ;;  %vm1671_vm15 = vcmask 1041409  }
  0x1e   :  { %1890 = vmatpush3.msra.mxu0 %v66_v0  ;;  %1897 = vmatprep.mubr.msk.f32.mxu0 %vm67_vm0, %v61_v2  ;;  %v63_v4 = vld [vmem:[%s2730_s1] sm:$0xff]  ;;  %v62_v5 = vld [vmem:[#allocation5 + $0x8] sm:$0xff]  ;;  %v266_v7 = vld [vmem:[%s2733_s4 + $0x30] sm:$0xff]  ;;  %v2206_v15 = vshrl.u32 %v149_v14, 7 }
  0x1f   :  { %1891 = vmatprep.subr.mxu0 %v65_v1  ;;  %1900 = vmatprep.subr.mxu1 %v267_v6  ;;  %v265_v8 = vld [vmem:[%s2733_s4 + $0x28] sm:$0xff]  ;;  %v264_v9 = vld [vmem:[%s2733_s4 + $0x20] sm:$0xff]  ;;  %v263_v10 = vld [vmem:[%s2733_s4 + $0x18] sm:$0xff] }
  0x20   :  { %1892 = vmatpush3.msra.mxu0 %v65_v1  ;;  %1901 = vmatpush3.msra.mxu1 %v267_v6  ;;  %v262_v11 = vld [vmem:[%s2733_s4 + $0x10] sm:$0xff]  ;;  %v261_v12 = vld [vmem:[%s2733_s4 + $0x8] sm:$0xff]  ;;  %v260_v13 = vld [vmem:[%s2733_s4] sm:$0xff]  ;;  %v151_v16 = vadd.s32 8, %v2206_v15  ;;  %v156_v17 = vand.u32 7, %v2206_v15  ;;  %vm194_vm1 = vcmp.lt.s32.totalorder %v2206_v15, 3 }
  0x21   :  { %1893 = vmatprep.subr.mxu0 %v64_v3  ;;  %1902 = vmatprep.subr.mxu1 %v266_v7  ;;  %v1848_v18 = vld [vmem:[%s2731_s2 + $0x3] ss:$0 sm:$0xff]  ;;  %vm212_vm3 = vcmp.lt.s32.totalorder %v2206_v15, 2  ;;  %vm230_vm4 = vcmp.lt.s32.totalorder %v2206_v15, 1  ;;  %v1849_v24 = vld [vmem:[%s2732_s3] ss:$0 sm:$0xff] }
  0x22   :  { %1894 = vmatpush3.msra.mxu0 %v64_v3  ;;  %1903 = vmatpush3.msra.mxu1 %v266_v7  ;;  %v163_v19 = vand.u32 7, %v151_v16  ;;  %vm198_vm2 = vcmp.ge.s32.totalorder %v156_v17, 3  ;;  %vm216_vm6 = vcmp.ge.s32.totalorder %v156_v17, 2  ;;  %v1850_v31 = vld [vmem:[%s2731_s2] ss:$0 sm:$0xff]  ;;  %vm234_vm8 = vcmp.ge.s32.totalorder %v156_v17, 1 }
  0x23   :  { %1895 = vmatprep.subr.mxu0 %v63_v4  ;;  %1904 = vmatprep.subr.mxu1 %v265_v8  ;;  %v1851_v36 = vld [vmem:[%s2731_s2 + $0x1] ss:$0 sm:$0xff]  ;;  %v1852_v49 = vld [vmem:[%s2731_s2 + $0x2] ss:$0 sm:$0xff]  ;;  %v2267_v6 = vsub.s32 0, %v2206_v15  ;;  %v567_v7 = vsub.s32 1, %v2206_v15 }
  0x24   :  { %1896 = vmatpush3.msra.mxu0 %v63_v4  ;;  %1905 = vmatpush3.msra.mxu1 %v265_v8  ;;  %vm199_vm5 = vcmp.ge.s32.totalorder %v163_v19, 3  ;;  %vm217_vm7 = vcmp.ge.s32.totalorder %v163_v19, 2  ;;  %vm235_vm9 = vcmp.ge.s32.totalorder %v163_v19, 1  ;;  %v1857_v8 = vld [vmem:[%s2734_s5] ss:$0 sm:$0xff]  ;;  %v603_v19 = vsub.s32 4, %v2206_v15 }
  0x25   :  { %1898 = vmatmul.mubr.msk.f32.vlgmr.msra.gmra.mxu0 %vm67_vm0, %v62_v5  ;;  %1906 = vmatprep.subr.mxu1 %v264_v9  ;;  %s2104_s5 = smov 64  }
  0x26   :  { %1907 = vmatpush3.msra.mxu1 %v264_v9 }
  0x27   :  { %1908 = vmatprep.subr.mxu1 %v263_v10 }
  0x28   :  { %1909 = vmatpush3.msra.mxu1 %v263_v10 }
  0x29   :  { %1910 = vmatprep.subr.mxu1 %v262_v11 }
  0x2a   :  { %1911 = vmatpush3.msra.mxu1 %v262_v11 }
  0x2b   :  { %1912 = vmatprep.subr.mxu1 %v261_v12 }
  0x2c   :  { %1913 = vmatpush3.msra.mxu1 %v261_v12 }
  0x2d   :  { %1914 = vmatprep.subr.mxu1 %v260_v13 }
  0x2e   :  { %1915 = vmatpush3.msra.mxu1 %v260_v13  ;;  %v579_v13 = vsub.s32 2, %v2206_v15 }
  0xe5   :  { %v2213_v20 = vpop.f32.mrf.mxu0 }
  0xe6   :  { %v183_v21 = vmul.f32 %v2213_v20, %v1848_v18  ;;  %v193_v22 = vrot.slane %v2213_v20, 5  ;;  %v211_v25 = vrot.slane %v2213_v20, 6  ;;  %v229_v29 = vrot.slane %v2213_v20, 7 }
  0xe7   :  { %v2220_v23 = vpop.f32.mrf.mxu0 }
  0xe8   :  { %v182_v26 = vmul.f32 %v1848_v18, %v2220_v23  ;;  %v192_v27 = vrot.slane %v2220_v23, 5  ;;  %v210_v28 = vrot.slane %v2220_v23, 6  ;;  %v228_v30 = vrot.slane %v2220_v23, 7 }
  0xe9   :  { %v191_v32 = vadd.f32 %v1849_v24, %v183_v21  ;;  %v591_v18 = vsub.s32 3, %v2206_v15  ;;  %v615_v21 = vsub.s32 5, %v2206_v15 }
  0xea   :  { %v195_v33 = vsel %vm194_vm1, %v192_v27, %v193_v22  ;;  %v196_v34 = vsel %vm194_vm1, %v193_v22, %v192_v27  ;;  %v213_v35 = vsel %vm212_vm3, %v210_v28, %v211_v25  ;;  %v190_v37 = vadd.f32 %v1849_v24, %v182_v26 }
  0xeb   :  { %v200_v38 = vsel %vm198_vm2, %v196_v34, 0.0  ;;  %v201_v39 = vsel %vm199_vm5, %v195_v33, 0.0  ;;  %v214_v40 = vsel %vm212_vm3, %v211_v25, %v210_v28  ;;  %v219_v44 = vsel %vm217_vm7, %v213_v35, 0.0 }
  0xec   :  { %v206_v41 = vmul.f32 %v1850_v31, %v200_v38  ;;  %v207_v42 = vmul.f32 %v1850_v31, %v201_v39  ;;  %v218_v43 = vsel %vm216_vm6, %v214_v40, 0.0  ;;  %v225_v46 = vmul.f32 %v1851_v36, %v219_v44 }
  0xed   :  { %v224_v45 = vmul.f32 %v1851_v36, %v218_v43  ;;  %v231_v47 = vsel %vm230_vm4, %v228_v30, %v229_v29  ;;  %v232_v48 = vsel %vm230_vm4, %v229_v29, %v228_v30  ;;  %v627_v22 = vsub.s32 6, %v2206_v15 }
  0xee   :  { %v208_v50 = vadd.f32 %v206_v41, %v190_v37  ;;  %v236_v51 = vsel %vm234_vm8, %v232_v48, 0.0  ;;  %v237_v52 = vsel %vm235_vm9, %v231_v47, 0.0  ;;  %v209_v53 = vadd.f32 %v207_v42, %v191_v32 }
  0xef   :  { %v242_v55 = vmul.f32 %v1852_v49, %v236_v51  ;;  %v243_v56 = vmul.f32 %v1852_v49, %v237_v52  ;;  %v639_v27 = vsub.s32 7, %v2206_v15  ;;  %vm1673_vm1 = vcmask 1042434  }
  0xf0   :  { %v226_v54 = vadd.f32 %v224_v45, %v208_v50  ;;  %v227_v57 = vadd.f32 %v225_v46, %v209_v53  ;;  %v2103_v45 = vmov 1966171168   ;;  %vm1675_vm2 = vcmask 1043459  }
  0xf1   :  { %v402_v46 = vunpack.c.l.s4 %v2103_v45  ;;  %vm1677_vm3 = vcmask 1044484   ;;  %vm1679_vm4 = vcmask 1045509   ;;  %vm1681_vm5 = vcmask 1046534  }
  0xf2   :  { %v244_v58 = vadd.f32 %v242_v55, %v226_v54  ;;  %v245_v59 = vadd.f32 %v243_v56, %v227_v57  ;;  %vm1683_vm6 = vcmask 1047559  }
  0xf3   :  { %v403_v50 = vunpack.c.0.s8 %v402_v46 }
  0xf4   :  { %v1853_v60 = vmul.f32 -1.442695, %v244_v58  ;;  %v1854_v61 = vmul.f32 -1.442695, %v245_v59 }
  0xf6   :  { %1945 = vpow2.f32 %v1853_v60 }
  0xf7   :  { %1947 = vpow2.f32 %v1854_v61 }
 0x103   :  { %v1946_v62 = vpop.eup %1945 }
 0x104   :  { %v1948_v63 = vpop.eup %1947  ;;  %v252_v0 = vadd.f32 1.0, %v1946_v62 }
 0x105   :  { %v253_v1 = vadd.f32 1.0, %v1948_v63 }
 0x106   :  { %1949 = vrcp.f32 %v252_v0 }
 0x107   :  { %1951 = vrcp.f32 %v253_v1 }
 0x113   :  { %v1950_v2 = vpop.eup %1949 }
 0x114   :  { %v1952_v3 = vpop.eup %1951  ;;  %v2258_v4 = vmul.f32 %v1950_v2, %v244_v58  ;;  %v2345_v58 = vsub.s32 %v403_v50, %v2206_v15 }
 0x115   :  { %v2260_v5 = vmul.f32 %v1952_v3, %v245_v59 }
 0x116   :  { %1916 = vmatprep.mubr.msk.f32.mxu1 %vm268_vm10, %v2258_v4 }
 0x117   :  { %1917 = vmatmul.mubr.msk.f32.vlgmr.msra.gmra.mxu1 %vm268_vm10, %v2260_v5 }
 0x1d7   :  { %v1918_v9 = vpop.f32.mrf.mxu1 }
 0x1d8   :  { %v2273_v10 = vadd.f32 %v1918_v9, %v1857_v8  ;;  %v2277_v11 = vrot.slane %v1918_v9, %v567_v7  ;;  %v2280_v12 = vrot.slane %v1918_v9, %v2267_v6  ;;  %v2298_v26 = vrot.slane %v1918_v9, %v579_v13 }
 0x1d9   :  { %v2283_v14 = vpop.f32.mrf.mxu1  ;;  %v2317_v35 = vrot.slane %v1918_v9, %v591_v18  ;;  %v2321_v36 = vrot.slane %v1918_v9, %v603_v19  ;;  %v2325_v37 = vrot.slane %v1918_v9, %v615_v21  ;;  %v2329_v38 = vrot.slane %v1918_v9, %v627_v22 }
 0x1da   :  { %v366_v16 = vand.u32 2147483647, %v2273_v10  ;;  %v2287_v17 = vadd.f32 %v1857_v8, %v2283_v14  ;;  %944 = vbcast.lane.b32.xlu0 %v2277_v11, 320  ;;  %932 = vbcast.lane.b32.xlu1 %v2280_v12, 320  ;;  %v2302_v28 = vrot.slane %v2283_v14, %v603_v19  ;;  %v2305_v29 = vrot.slane %v2283_v14, %v615_v21 }
 0x1db   :  { %v2308_v30 = vrot.slane %v2283_v14, %v627_v22  ;;  %v2313_v33 = vrot.slane %v2283_v14, %v639_v27  ;;  %v2333_v43 = vrot.slane %v1918_v9, %v639_v27  ;;  %v360_v57 = vmax.f32 %v2273_v10, 0.0  ;;  %v2373_v27 = vld [vmem:[#allocation8 + $0x8] sm:$0xff] }
 0x1dc   :  { %v368_v24 = vsub.f32 0.0, %v366_v16  ;;  %v365_v25 = vand.u32 2147483647, %v2287_v17  ;;  %v359_v63 = vmax.f32 %v2287_v17, 0.0  ;;  %vm362_vm13 = vcmp.ne.f32.partialorder %v2273_v10, %v2273_v10 }
 0x1dd   :  { %vm361_vm14 = vcmp.ne.f32.partialorder %v2287_v17, %v2287_v17 }
 0x1de   :  { %v371_v31 = vmul.f32 1.442695, %v368_v24  ;;  %v367_v32 = vsub.f32 0.0, %v365_v25  ;;  %956 = vbcast.lane.b32.xlu0 %v2298_v26, 320  ;;  %936 = vbcast.lane.b32.xlu1 %v2280_v12, 328  ;;  %v2370_v24 = vld [vmem:[#allocation8] sm:$0xff] }
 0x1e0   :  { %1953 = vpow2.f32 %v371_v31  ;;  %v369_v34 = vmul.f32 1.442695, %v367_v32 }
 0x1e2   :  { %1955 = vpow2.f32 %v369_v34  ;;  %968 = vbcast.lane.b32.xlu0 %v2317_v35, 320  ;;  %948 = vbcast.lane.b32.xlu1 %v2277_v11, 328 }
 0x1e6   :  { %980 = vbcast.lane.b32.xlu0 %v2321_v36, 320  ;;  %960 = vbcast.lane.b32.xlu1 %v2298_v26, 328 }
 0x1ea   :  { %992 = vbcast.lane.b32.xlu0 %v2325_v37, 320  ;;  %972 = vbcast.lane.b32.xlu1 %v2317_v35, 328 }
 0x1ed   :  { %v1954_v39 = vpop.eup %1953 }
 0x1ee   :  { %v382_v40 = vadd.f32 1.0, %v1954_v39  ;;  %1004 = vbcast.lane.b32.xlu0 %v2329_v38, 320  ;;  %984 = vbcast.lane.b32.xlu1 %v2321_v36, 328  ;;  %v385_v44 = vmul.f32 -0.5, %v1954_v39  ;;  %v388_v49 = vand.u32 2147483647, %v1954_v39 }
 0x1ef   :  { %v1956_v41 = vpop.eup %1955 }
 0x1f0   :  { %1957 = vlog2.f32 %v382_v40  ;;  %v373_v42 = vadd.f32 1.0, %v1956_v41  ;;  %v376_v47 = vmul.f32 -0.5, %v1956_v41  ;;  %v386_v48 = vadd.f32 1.0, %v385_v44 }
 0x1f1   :  { %v379_v53 = vand.u32 2147483647, %v1956_v41  ;;  %vm389_vm11 = vcmp.lt.f32.partialorder %v388_v49, 0.0004427343 }
 0x1f2   :  { %1959 = vlog2.f32 %v373_v42  ;;  %1016 = vbcast.lane.b32.xlu0 %v2333_v43, 320  ;;  %996 = vbcast.lane.b32.xlu1 %v2325_v37, 328  ;;  %v377_v51 = vadd.f32 1.0, %v376_v47  ;;  %v387_v55 = vmul.f32 %v1954_v39, %v386_v48 }
 0x1f3   :  { %vm380_vm12 = vcmp.lt.f32.partialorder %v379_v53, 0.0004427343 }
 0x1f4   :  { %v378_v61 = vmul.f32 %v1956_v41, %v377_v51 }
 0x1f6   :  { %1513 = vbcast.lane.b32.xlu0 %v2280_v12, 336  ;;  %1008 = vbcast.lane.b32.xlu1 %v2329_v38, 328 }
 0x1fa   :  { %1521 = vbcast.lane.b32.xlu0 %v2277_v11, 336  ;;  %1020 = vbcast.lane.b32.xlu1 %v2333_v43, 328 }
 0x1fd   :  { %v1958_v52 = vpop.eup %1957 }
 0x1fe   :  { %v384_v54 = vmul.f32 0.6931472, %v1958_v52  ;;  %1529 = vbcast.lane.b32.xlu0 %v2298_v26, 336  ;;  %1517 = vbcast.lane.b32.xlu1 %v2280_v12, 344 }
 0x1ff   :  { %v1960_v56 = vpop.eup %1959 }
 0x200   :  { %v390_v59 = vsel %vm389_vm11, %v387_v55, %v384_v54  ;;  %v375_v60 = vmul.f32 0.6931472, %v1960_v56 }
 0x201   :  { %v392_v62 = vadd.f32 %v390_v59, %v360_v57 }
 0x202   :  { %v381_v0 = vsel %vm380_vm12, %v378_v61, %v375_v60  ;;  %1537 = vbcast.lane.b32.xlu0 %v2317_v35, 336  ;;  %1525 = vbcast.lane.b32.xlu1 %v2277_v11, 344 }
 0x203   :  { %v2353_v1 = vsel %vm362_vm13, %v2273_v10, %v392_v62  ;;  %v391_v2 = vadd.f32 %v381_v0, %v359_v63 }
 0x204   :  { %v772_v3 = vcombine.high %v2353_v1, %v2353_v1  ;;  %v779_v8 = vrot.slane %v2353_v1, %v2345_v58 }
 0x205   :  { %v2365_v10 = vsel %vm361_vm14, %v2287_v17, %v391_v2 }
 0x206   :  { %v786_v9 = vrot.slane %v772_v3, %v2345_v58  ;;  %v787_v12 = vcombine.high %v779_v8, %v779_v8  ;;  %v795_v16 = vrot.slane %v779_v8, %v2345_v58  ;;  %1545 = vbcast.lane.b32.xlu0 %v2321_v36, 336  ;;  %1533 = vbcast.lane.b32.xlu1 %v2298_v26, 344 }
 0x207   :  { %v400_v34 = vcombine.high %v2365_v10, %v2365_v10  ;;  %v407_v39 = vrot.slane %v2365_v10, %v2345_v58 }
 0x208   :  { %v788_v11 = vcombine.high %v786_v9, %v786_v9  ;;  %v802_v19 = vrot.slane %v786_v9, %v2345_v58  ;;  %v809_v21 = vrot.slane %v787_v12, %v2345_v58  ;;  %v817_v22 = vcombine.high %v795_v16, %v795_v16 }
 0x209   :  { %v824_v25 = vrot.slane %v795_v16, %v2267_v6  ;;  %v414_v52 = vrot.slane %v400_v34, %v2345_v58  ;;  %v415_v53 = vcombine.high %v407_v39, %v407_v39  ;;  %v423_v2 = vrot.slane %v407_v39, %v2345_v58 }
 0x20a   :  { %v816_v31 = vrot.slane %v788_v11, %v2345_v58  ;;  %v819_v32 = vcombine.high %v809_v21, %v809_v21  ;;  %v828_v17 = vrot.slane %v809_v21, %v2267_v6  ;;  %1553 = vbcast.lane.b32.xlu0 %v2325_v37, 336  ;;  %v832_v26 = vrot.slane %v817_v22, %v2267_v6 }
 0x20b   :  { %1541 = vbcast.lane.b32.xlu1 %v2317_v35, 344  ;;  %v818_v40 = vcombine.high %v802_v19, %v802_v19  ;;  %v861_v44 = vmul.f32 %v824_v25, %v2370_v24  ;;  %v862_v45 = vmul.f32 %v824_v25, %v2373_v27  ;;  %v840_v48 = vrot.slane %v802_v19, %v2267_v6 }
 0x20c   :  { %v820_v41 = vcombine.high %v816_v31, %v816_v31  ;;  %v836_v42 = vrot.slane %v819_v32, %v2267_v6  ;;  %v863_v46 = vmul.f32 %v828_v17, %v2370_v24  ;;  %v864_v47 = vmul.f32 %v828_v17, %v2373_v27 }
 0x20d   :  { %v865_v49 = vmul.f32 %v832_v26, %v2370_v24  ;;  %v2394_v35 = vrot.slane %v2283_v14, %v2267_v6  ;;  %v844_v50 = vrot.slane %v816_v31, %v2267_v6  ;;  %v866_v51 = vmul.f32 %v832_v26, %v2373_v27 }
 0x20e   :  { %1561 = vbcast.lane.b32.xlu0 %v2329_v38, 336  ;;  %v848_v54 = vrot.slane %v818_v40, %v2267_v6  ;;  %v852_v55 = vrot.slane %v820_v41, %v2267_v6  ;;  %v867_v56 = vmul.f32 %v836_v42, %v2370_v24  ;;  %v877_v57 = vmul.f32 1.442695, %v861_v44 }
 0x20f   :  { %1549 = vbcast.lane.b32.xlu1 %v2321_v36, 344  ;;  %v868_v59 = vmul.f32 %v836_v42, %v2373_v27  ;;  %v879_v60 = vmul.f32 1.442695, %v862_v45  ;;  %v881_v61 = vmul.f32 1.442695, %v863_v46  ;;  %v869_v63 = vmul.f32 %v840_v48, %v2370_v24 }
 0x210   :  { %v883_v62 = vmul.f32 1.442695, %v864_v47  ;;  %1961 = vpow2.f32 %v877_v57  ;;  %v885_v0 = vmul.f32 1.442695, %v865_v49  ;;  %v870_v36 = vmul.f32 %v840_v48, %v2373_v27 }
 0x211   :  { %v871_v3 = vmul.f32 %v844_v50, %v2370_v24  ;;  %1963 = vpow2.f32 %v879_v60  ;;  %v887_v8 = vmul.f32 1.442695, %v866_v51  ;;  %v872_v9 = vmul.f32 %v844_v50, %v2373_v27 }
 0x212   :  { %v873_v12 = vmul.f32 %v848_v54, %v2370_v24  ;;  %1965 = vpow2.f32 %v881_v61  ;;  %v889_v16 = vmul.f32 1.442695, %v867_v56  ;;  %v874_v11 = vmul.f32 %v848_v54, %v2373_v27  ;;  %559 = vbcast.lane.b32.xlu0 %v2394_v35, 320 }
 0x213   :  { %v875_v19 = vmul.f32 %v852_v55, %v2370_v24  ;;  %1967 = vpow2.f32 %v883_v62  ;;  %v891_v21 = vmul.f32 1.442695, %v868_v59  ;;  %v876_v22 = vmul.f32 %v852_v55, %v2373_v27  ;;  %1557 = vbcast.lane.b32.xlu1 %v2325_v37, 344 }
 0x214   :  { %1969 = vpow2.f32 %v885_v0  ;;  %v893_v25 = vmul.f32 1.442695, %v869_v63  ;;  %v437_v31 = vrot.slane %v415_v53, %v2345_v58  ;;  %v895_v32 = vmul.f32 1.442695, %v870_v36 }
 0x215   :  { %1971 = vpow2.f32 %v887_v8  ;;  %v416_v17 = vcombine.high %v414_v52, %v414_v52  ;;  %v445_v26 = vcombine.high %v423_v2, %v423_v2  ;;  %v897_v34 = vmul.f32 1.442695, %v871_v3 }
 0x216   :  { %1973 = vpow2.f32 %v889_v16  ;;  %v447_v39 = vcombine.high %v437_v31, %v437_v31  ;;  %v452_v40 = vrot.slane %v423_v2, %v2267_v6  ;;  %v899_v41 = vmul.f32 1.442695, %v872_v9  ;;  %563 = vbcast.lane.b32.xlu0 %v2394_v35, 328 }
 0x217   :  { %1975 = vpow2.f32 %v891_v21  ;;  %v456_v42 = vrot.slane %v437_v31, %v2267_v6  ;;  %v2421_v44 = vrot.slane %v2283_v14, %v567_v7  ;;  %v901_v37 = vmul.f32 1.442695, %v873_v12  ;;  %1565 = vbcast.lane.b32.xlu1 %v2329_v38, 344 }
 0x218   :  { %1977 = vpow2.f32 %v893_v25  ;;  %v430_v45 = vrot.slane %v414_v52, %v2345_v58  ;;  %v460_v46 = vrot.slane %v445_v26, %v2267_v6  ;;  %v903_v47 = vmul.f32 1.442695, %v874_v11 }
 0x219   :  { %1979 = vpow2.f32 %v895_v32  ;;  %v905_v48 = vmul.f32 1.442695, %v875_v19  ;;  %v444_v49 = vrot.slane %v416_v17, %v2345_v58  ;;  %v907_v50 = vmul.f32 1.442695, %v876_v22 }
 0x21a   :  { %1981 = vpow2.f32 %v897_v34  ;;  %v464_v7 = vrot.slane %v447_v39, %v2267_v6  ;;  %v489_v51 = vmul.f32 %v452_v40, %v2370_v24  ;;  %v490_v52 = vmul.f32 %v452_v40, %v2373_v27  ;;  %571 = vbcast.lane.b32.xlu0 %v2421_v44, 320 }
 0x21b   :  { %1983 = vpow2.f32 %v899_v41  ;;  %v491_v53 = vmul.f32 %v456_v42, %v2370_v24  ;;  %v492_v38 = vmul.f32 %v456_v42, %v2373_v27  ;;  %v446_v54 = vcombine.high %v430_v45, %v430_v45  ;;  %575 = vbcast.lane.b32.xlu1 %v2421_v44, 328 }
 0x21c   :  { %1985 = vpow2.f32 %v901_v37  ;;  %v468_v55 = vrot.slane %v430_v45, %v2267_v6  ;;  %v493_v56 = vmul.f32 %v460_v46, %v2370_v24  ;;  %v448_v59 = vcombine.high %v444_v49, %v444_v49 }
 0x21d   :  { %v1962_v57 = vpop.eup %1961  ;;  %1987 = vpow2.f32 %v903_v47  ;;  %v472_v60 = vrot.slane %v444_v49, %v2267_v6  ;;  %v494_v61 = vmul.f32 %v460_v46, %v2373_v27  ;;  %v495_v63 = vmul.f32 %v464_v7, %v2370_v24 }
 0x21e   :  { %v1964_v62 = vpop.eup %1963  ;;  %1989 = vpow2.f32 %v905_v48  ;;  %910 = vst.msk [vmem:[#allocation2 + $0x10] sm:$0xff] %vm268_vm10, %v1962_v57  ;;  %v496_v0 = vmul.f32 %v464_v7, %v2373_v27  ;;  %v505_v2 = vmul.f32 1.442695, %v489_v51  ;;  %v507_v3 = vmul.f32 1.442695, %v490_v52 }
 0x21f   :  { %v1966_v36 = vpop.eup %1965  ;;  %1991 = vpow2.f32 %v907_v50  ;;  %911 = vst.msk [vmem:[#allocation2 + $0x18] sm:$0xff] %vm268_vm10, %v1964_v62  ;;  %v509_v8 = vmul.f32 1.442695, %v491_v53  ;;  %v511_v9 = vmul.f32 1.442695, %v492_v38  ;;  %v476_v16 = vrot.slane %v446_v54, %v2267_v6 }
 0x220   :  { %v1968_v12 = vpop.eup %1967  ;;  %912 = vst.msk [vmem:[#allocation2 + $0x30] sm:$0xff] %vm268_vm10, %v1966_v36  ;;  %v497_v11 = vmul.f32 %v468_v55, %v2370_v24  ;;  %1993 = vpow2.f32 %v505_v2  ;;  %v513_v19 = vmul.f32 1.442695, %v493_v56  ;;  %v498_v22 = vmul.f32 %v468_v55, %v2373_v27 }
 0x221   :  { %v1970_v21 = vpop.eup %1969  ;;  %913 = vst.msk [vmem:[#allocation2 + $0x38] sm:$0xff] %vm268_vm10, %v1968_v12  ;;  %1995 = vpow2.f32 %v507_v3  ;;  %v515_v25 = vmul.f32 1.442695, %v494_v61  ;;  %v2451_v31 = vrot.slane %v2283_v14, %v579_v13  ;;  %v480_v17 = vrot.slane %v448_v59, %v2267_v6 }
 0x222   :  { %v1972_v32 = vpop.eup %1971  ;;  %914 = vst.msk [vmem:[#allocation2 + $0x50] sm:$0xff] %vm268_vm10, %v1970_v21  ;;  %v499_v26 = vmul.f32 %v472_v60, %v2370_v24  ;;  %1997 = vpow2.f32 %v509_v8  ;;  %v517_v34 = vmul.f32 1.442695, %v495_v63  ;;  %v500_v40 = vmul.f32 %v472_v60, %v2373_v27 }
 0x223   :  { %v1974_v39 = vpop.eup %1973  ;;  %915 = vst.msk [vmem:[#allocation2 + $0x58] sm:$0xff] %vm268_vm10, %v1972_v32  ;;  %1999 = vpow2.f32 %v511_v9  ;;  %v519_v41 = vmul.f32 1.442695, %v496_v0  ;;  %v501_v13 = vmul.f32 %v476_v16, %v2370_v24  ;;  %v521_v37 = vmul.f32 1.442695, %v497_v11  ;;  %587 = vbcast.lane.b32.xlu1 %v2451_v31, 328 }
 0x224   :  { %v1976_v42 = vpop.eup %1975  ;;  %916 = vst.msk [vmem:[#allocation2 + $0x70] sm:$0xff] %vm268_vm10, %v1974_v39  ;;  %2001 = vpow2.f32 %v513_v19  ;;  %583 = vbcast.lane.b32.xlu0 %v2451_v31, 320  ;;  %v502_v46 = vmul.f32 %v476_v16, %v2373_v27  ;;  %v523_v47 = vmul.f32 1.442695, %v498_v22  ;;  %v2467_v48 = vrot.slane %v2283_v14, %v591_v18 }
 0x225   :  { %v1978_v45 = vpop.eup %1977  ;;  %917 = vst.msk [vmem:[#allocation2 + $0x78] sm:$0xff] %vm268_vm10, %v1976_v42  ;;  %2003 = vpow2.f32 %v515_v25  ;;  %v503_v50 = vmul.f32 %v480_v17, %v2370_v24  ;;  %v525_v7 = vmul.f32 1.442695, %v499_v26  ;;  %v397_v51 = vmul.f32 %v2365_v10, %v2258_v4 }
 0x226   :  { %v1980_v49 = vpop.eup %1979  ;;  %918 = vst.msk [vmem:[#allocation2 + $0x90] sm:$0xff] %vm268_vm10, %v1978_v45  ;;  %2005 = vpow2.f32 %v517_v34  ;;  %v504_v53 = vmul.f32 %v480_v17, %v2373_v27  ;;  %v527_v15 = vmul.f32 1.442695, %v500_v40  ;;  %v529_v14 = vmul.f32 1.442695, %v501_v13 }
 0x227   :  { %v1982_v52 = vpop.eup %1981  ;;  %919 = vst.msk [vmem:[#allocation2 + $0x98] sm:$0xff] %vm268_vm10, %v1980_v49  ;;  %2007 = vpow2.f32 %v519_v41  ;;  %599 = vbcast.lane.b32.xlu1 %v2467_v48, 328  ;;  %v531_v10 = vmul.f32 1.442695, %v502_v46  ;;  %v533_v27 = vmul.f32 1.442695, %v503_v50  ;;  %v657_v54 = vrot.slane %v397_v51, %v2345_v58 }
 0x228   :  { %v1984_v38 = vpop.eup %1983  ;;  %920 = vst.msk [vmem:[#allocation2 + $0xb0] sm:$0xff] %vm268_vm10, %v1982_v52  ;;  %2009 = vpow2.f32 %v521_v37  ;;  %595 = vbcast.lane.b32.xlu0 %v2467_v48, 320  ;;  %v650_v55 = vcombine.high %v397_v51, %v397_v51  ;;  %v535_v57 = vmul.f32 1.442695, %v504_v53  ;;  %v1860_v22 = vmul.f32 -1.442695, %v2213_v20 }
 0x229   :  { %v1986_v18 = vpop.eup %1985  ;;  %921 = vst.msk [vmem:[#allocation2 + $0xb8] sm:$0xff] %vm268_vm10, %v1984_v38  ;;  %2011 = vpow2.f32 %v523_v47  ;;  %v2486_v60 = vrot.slane %v657_v54, %v2345_v58  ;;  %v665_v61 = vcombine.high %v657_v54, %v657_v54  ;;  %v1859_v17 = vmul.f32 -1.442695, %v2220_v23 }
 0x22a   :  { %v1988_v24 = vpop.eup %1987  ;;  %922 = vst.msk [vmem:[#allocation2 + $0xd0] sm:$0xff] %vm268_vm10, %v1986_v18  ;;  %2013 = vpow2.f32 %v525_v7  ;;  %v664_v63 = vrot.slane %v650_v55, %v2345_v58  ;;  %v398_v40 = vmul.f32 %v2353_v1, %v2260_v5 }
 0x22b   :  { %v1990_v56 = vpop.eup %1989  ;;  %923 = vst.msk [vmem:[#allocation2 + $0xd8] sm:$0xff] %vm268_vm10, %v1988_v24  ;;  %2015 = vpow2.f32 %v527_v15  ;;  %611 = vbcast.lane.b32.xlu1 %v2302_v28, 328  ;;  %v2492_v2 = vrot.slane %v665_v61, %v2345_v58 }
 0x22c   :  { %v1992_v59 = vpop.eup %1991  ;;  %924 = vst.msk [vmem:[#allocation2 + $0xf0] sm:$0xff] %vm268_vm10, %v1990_v56  ;;  %2017 = vpow2.f32 %v529_v14  ;;  %607 = vbcast.lane.b32.xlu0 %v2302_v28, 320  ;;  %v2496_v3 = vrot.slane %v664_v63, %v2345_v58  ;;  %v666_v8 = vcombine.high %v664_v63, %v664_v63  ;;  %v1030_v37 = vrot.slane %v398_v40, %v2345_v58 }
 0x22d   :  { %v1994_v62 = vpop.eup %1993  ;;  %925 = vst.msk [vmem:[#allocation2 + $0xf8] sm:$0xff] %vm268_vm10, %v1992_v59  ;;  %2019 = vpow2.f32 %v531_v10  ;;  %v1023_v51 = vcombine.high %v398_v40, %v398_v40 }
 0x22e   :  { %v1996_v0 = vpop.eup %1995  ;;  %2021 = vpow2.f32 %v533_v27  ;;  %537 = vst.msk [vmem:[#allocation2] sm:$0xff] %vm268_vm10, %v1994_v62  ;;  %v2503_v16 = vrot.slane %v666_v8, %v2345_v58  ;;  %v1038_v1 = vcombine.high %v1030_v37, %v1030_v37  ;;  %v1046_v47 = vrot.slane %v1030_v37, %v2345_v58  ;;  %v1191_v37 = vld [vmem:[#allocation2 + $0x50] sm:$0xff] }
 0x22f   :  { %v1998_v36 = vpop.eup %1997  ;;  %2023 = vpow2.f32 %v535_v57  ;;  %538 = vst.msk [vmem:[#allocation2 + $0x8] sm:$0xff] %vm268_vm10, %v1996_v0  ;;  %623 = vbcast.lane.b32.xlu1 %v2305_v29, 328  ;;  %v1037_v18 = vrot.slane %v1023_v51, %v2345_v58 }
 0x230   :  { %v2000_v9 = vpop.eup %1999  ;;  %539 = vst.msk [vmem:[#allocation2 + $0x20] sm:$0xff] %vm268_vm10, %v1998_v36  ;;  %619 = vbcast.lane.b32.xlu0 %v2305_v29, 320  ;;  %2025 = vpow2.f32 %v1860_v22  ;;  %v1060_v46 = vrot.slane %v1038_v1, %v2345_v58  ;;  %v1068_v7 = vcombine.high %v1046_v47, %v1046_v47  ;;  %v1169_v1 = vld [vmem:[#allocation2 + $0x38] sm:$0xff] }
 0x231   :  { %v2002_v12 = vpop.eup %2001  ;;  %540 = vst.msk [vmem:[#allocation2 + $0x28] sm:$0xff] %vm268_vm10, %v2000_v9  ;;  %2027 = vpow2.f32 %v1859_v17  ;;  %v1053_v56 = vrot.slane %v1037_v18, %v2345_v58  ;;  %v1039_v57 = vcombine.high %v1037_v18, %v1037_v18 }
 0x232   :  { %v2004_v11 = vpop.eup %2003  ;;  %541 = vst.msk [vmem:[#allocation2 + $0x40] sm:$0xff] %vm268_vm10, %v2002_v12  ;;  %v1079_v50 = vrot.slane %v1060_v46, %v2267_v6  ;;  %v1070_v14 = vcombine.high %v1060_v46, %v1060_v46 }
 0x233   :  { %v2006_v19 = vpop.eup %2005  ;;  %542 = vst.msk [vmem:[#allocation2 + $0x48] sm:$0xff] %vm268_vm10, %v2004_v11  ;;  %635 = vbcast.lane.b32.xlu1 %v2308_v30, 328  ;;  %v1091_v8 = vrot.slane %v1053_v56, %v2267_v6  ;;  %v1067_v9 = vrot.slane %v1039_v57, %v2345_v58  ;;  %v1237_v57 = vld [vmem:[#allocation2 + $0x90] sm:$0xff] }
 0x234   :  { %v2008_v21 = vpop.eup %2007  ;;  %543 = vst.msk [vmem:[#allocation2 + $0x60] sm:$0xff] %vm268_vm10, %v2006_v19  ;;  %631 = vbcast.lane.b32.xlu0 %v2308_v30, 320  ;;  %v1087_v55 = vrot.slane %v1070_v14, %v2267_v6  ;;  %v1192_v14 = vld [vmem:[#allocation2 + $0x58] sm:$0xff] }
 0x235   :  { %v2010_v25 = vpop.eup %2009  ;;  %544 = vst.msk [vmem:[#allocation2 + $0x68] sm:$0xff] %vm268_vm10, %v2008_v21  ;;  %v1168_v21 = vld [vmem:[#allocation2 + $0x30] sm:$0xff]  ;;  %v1095_v58 = vrot.slane %v1067_v9, %v2267_v6 }
 0x236   :  { %v2012_v32 = vpop.eup %2011  ;;  %545 = vst.msk [vmem:[#allocation2 + $0x80] sm:$0xff] %vm268_vm10, %v2010_v25 }
 0x237   :  { %v2014_v26 = vpop.eup %2013  ;;  %546 = vst.msk [vmem:[#allocation2 + $0x88] sm:$0xff] %vm268_vm10, %v2012_v32  ;;  %647 = vbcast.lane.b32.xlu1 %v2313_v33, 328 }
 0x238   :  { %v2016_v34 = vpop.eup %2015  ;;  %547 = vst.msk [vmem:[#allocation2 + $0xa0] sm:$0xff] %vm268_vm10, %v2014_v26  ;;  %643 = vbcast.lane.b32.xlu0 %v2313_v33, 320 }
 0x239   :  { %v2018_v39 = vpop.eup %2017  ;;  %548 = vst.msk [vmem:[#allocation2 + $0xa8] sm:$0xff] %vm268_vm10, %v2016_v34  ;;  %v1069_v34 = vcombine.high %v1053_v56, %v1053_v56 }
 0x23a   :  { %v2020_v41 = vpop.eup %2019  ;;  %549 = vst.msk [vmem:[#allocation2 + $0xc0] sm:$0xff] %vm268_vm10, %v2018_v39 }
 0x23b   :  { %v2022_v42 = vpop.eup %2021  ;;  %550 = vst.msk [vmem:[#allocation2 + $0xc8] sm:$0xff] %vm268_vm10, %v2020_v41  ;;  %1348 = vbcast.lane.b32.xlu1 %v2394_v35, 344 }
 0x23c   :  { %v2024_v13 = vpop.eup %2023  ;;  %551 = vst.msk [vmem:[#allocation2 + $0xe0] sm:$0xff] %vm268_vm10, %v2022_v42  ;;  %1344 = vbcast.lane.b32.xlu0 %v2394_v35, 336 }
 0x23d   :  { %552 = vst.msk [vmem:[#allocation2 + $0xe8] sm:$0xff] %vm268_vm10, %v2024_v13  ;;  %v2026_v45 = vpop.eup %2025 }
 0x23e   :  { %v2028_v49 = vpop.eup %2027  ;;  %v1720_v35 = vadd.f32 1.0, %v2026_v45 }
 0x23f   :  { %1356 = vbcast.lane.b32.xlu1 %v2421_v44, 344  ;;  %v1719_v52 = vadd.f32 1.0, %v2028_v49 }
 0x240   :  { %1352 = vbcast.lane.b32.xlu0 %v2421_v44, 336  ;;  %v1075_v44 = vrot.slane %v1046_v47, %v2267_v6  ;;  %2029 = vrcp.f32 %v1720_v35 }
 0x241   :  { %2031 = vrcp.f32 %v1719_v52 }
 0x243   :  { %1364 = vbcast.lane.b32.xlu1 %v2451_v31, 344 }
 0x244   :  { %1360 = vbcast.lane.b32.xlu0 %v2451_v31, 336 }
 0x247   :  { %1372 = vbcast.lane.b32.xlu1 %v2467_v48, 344 }
 0x248   :  { %1368 = vbcast.lane.b32.xlu0 %v2467_v48, 336  ;;  %v1083_v48 = vrot.slane %v1068_v7, %v2267_v6  ;;  %v1071_v7 = vcombine.high %v1067_v9, %v1067_v9 }
 0x24b   :  { %1380 = vbcast.lane.b32.xlu1 %v2302_v28, 344 }
 0x24c   :  { %v945_v53 = vpop.permute.xlu0 %944  ;;  %v933_v31 = vpop.permute.xlu1 %932  ;;  %1376 = vbcast.lane.b32.xlu0 %v2302_v28, 336  ;;  %v1147_v28 = vld [vmem:[#allocation2 + $0x10] sm:$0xff] }
 0x24d   :  { %v1114_v15 = vmul.f32 %v1079_v50, %v945_v53  ;;  %v1112_v38 = vmul.f32 %v1075_v44, %v933_v31  ;;  %v1151_v0 = vmul.f32 0.0, %v1147_v28  ;;  %v2030_v41 = vpop.eup %2029 }
 0x24e   :  { %v2032_v45 = vpop.eup %2031  ;;  %v1726_v53 = vmul.f32 %v2030_v41, %v2213_v20  ;;  %v1103_v20 = vrot.slane %v1071_v7, %v2267_v6 }
 0x24f   :  { %1131 = vst.msk [vmem:[#allocation3 + $0x30] sm:$0xff] %vm268_vm10, %v1114_v15  ;;  %1129 = vst.msk [vmem:[#allocation3 + $0x10] sm:$0xff] %vm268_vm10, %v1112_v38  ;;  %1388 = vbcast.lane.b32.xlu1 %v2305_v29, 344  ;;  %v1725_v31 = vmul.f32 %v2032_v45, %v2220_v23  ;;  %v1261_v45 = vld [vmem:[#allocation2 + $0xb8] sm:$0xff] }
 0x250   :  { %v957_v10 = vpop.permute.xlu0 %956  ;;  %v937_v24 = vpop.permute.xlu1 %936  ;;  %1384 = vbcast.lane.b32.xlu0 %v2305_v29, 336  ;;  %v1148_v29 = vld [vmem:[#allocation2 + $0x18] sm:$0xff] }
 0x251   :  { %v1116_v27 = vmul.f32 %v1083_v48, %v957_v10  ;;  %v1113_v54 = vmul.f32 %v1075_v44, %v937_v24  ;;  %v1152_v17 = vmul.f32 0.0, %v1148_v29  ;;  %v1099_v44 = vrot.slane %v1069_v34, %v2267_v6  ;;  %v1743_v29 = vld [vmem:[%s2737_s8 + $0x30] sm:$0xff] }
 0x253   :  { %1133 = vst.msk [vmem:[#allocation3 + $0x50] sm:$0xff] %vm268_vm10, %v1116_v27  ;;  %1130 = vst.msk [vmem:[#allocation3 + $0x18] sm:$0xff] %vm268_vm10, %v1113_v54  ;;  %1396 = vbcast.lane.b32.xlu1 %v2308_v30, 344 }
 0x254   :  { %v969_v59 = vpop.permute.xlu0 %968  ;;  %v949_v61 = vpop.permute.xlu1 %948  ;;  %1392 = vbcast.lane.b32.xlu0 %v2308_v30, 336 }
 0x255   :  { %v1118_v62 = vmul.f32 %v1087_v55, %v969_v59  ;;  %v1115_v63 = vmul.f32 %v1079_v50, %v949_v61  ;;  %v1215_v59 = vld [vmem:[#allocation2 + $0x78] sm:$0xff] }
 0x256   :  { %v1155_v36 = vld [vmem:[#allocation3 + $0x10] sm:$0xff] }
 0x257   :  { %1135 = vst.msk [vmem:[#allocation3 + $0x70] sm:$0xff] %vm268_vm10, %v1118_v62  ;;  %1132 = vst.msk [vmem:[#allocation3 + $0x38] sm:$0xff] %vm268_vm10, %v1115_v63  ;;  %v1159_v12 = vadd.f32 %v1155_v36, %v1151_v0  ;;  %v1177_v30 = vld [vmem:[#allocation3 + $0x30] sm:$0xff]  ;;  %1404 = vbcast.lane.b32.xlu1 %v2313_v33, 344  ;;  %v1744_v36 = vld [vmem:[%s2737_s8 + $0x38] sm:$0xff] }
 0x258   :  { %v981_v11 = vpop.permute.xlu0 %980  ;;  %v961_v19 = vpop.permute.xlu1 %960  ;;  %1400 = vbcast.lane.b32.xlu0 %v2313_v33, 336  ;;  %1919 = vmatprep.subr.mxu0 %v1744_v36 }
 0x259   :  { %v1120_v22 = vmul.f32 %v1091_v8, %v981_v11  ;;  %v1117_v25 = vmul.f32 %v1083_v48, %v961_v19  ;;  %1163 = vst.msk [vmem:[#allocation4 + $0x10] sm:$0xff] %vm268_vm10, %v1159_v12  ;;  %v1172_v32 = vmul.f32 %v1168_v21, %v1159_v12  ;;  %v1214_v48 = vld [vmem:[#allocation2 + $0x70] sm:$0xff]  ;;  %1920 = vmatpush3.msra.mxu0 %v1744_v36  ;;  %v1742_v19 = vld [vmem:[%s2737_s8 + $0x28] sm:$0xff] }
 0x25a   :  { %v1156_v26 = vld [vmem:[#allocation3 + $0x18] sm:$0xff]  ;;  %v1200_v35 = vld [vmem:[#allocation3 + $0x50] sm:$0xff]  ;;  %1921 = vmatprep.subr.mxu0 %v1743_v29 }
 0x25b   :  { %1137 = vst.msk [vmem:[#allocation3 + $0x90] sm:$0xff] %vm268_vm10, %v1120_v22  ;;  %1134 = vst.msk [vmem:[#allocation3 + $0x58] sm:$0xff] %vm268_vm10, %v1117_v25  ;;  %v1181_v39 = vadd.f32 %v1177_v30, %v1172_v32  ;;  %v1160_v40 = vadd.f32 %v1156_v26, %v1152_v17  ;;  %1573 = vbcast.lane.b32.xlu1 %v2333_v43, 344  ;;  %v1260_v25 = vld [vmem:[#allocation2 + $0xb0] sm:$0xff]  ;;  %v1238_v32 = vld [vmem:[#allocation2 + $0x98] sm:$0xff]  ;;  %1922 = vmatpush3.msra.mxu0 %v1743_v29 }
 0x25c   :  { %v993_v42 = vpop.permute.xlu0 %992  ;;  %v973_v13 = vpop.permute.xlu1 %972  ;;  %1569 = vbcast.lane.b32.xlu0 %v2333_v43, 336  ;;  %1923 = vmatprep.subr.mxu0 %v1742_v19 }
 0x25d   :  { %v1122_v46 = vmul.f32 %v1095_v58, %v993_v42  ;;  %v1119_v47 = vmul.f32 %v1087_v55, %v973_v13  ;;  %1186 = vst.msk [vmem:[#allocation4 + $0x30] sm:$0xff] %vm268_vm10, %v1181_v39  ;;  %v1195_v33 = vmul.f32 %v1191_v37, %v1181_v39  ;;  %1164 = vst.msk [vmem:[#allocation4 + $0x18] sm:$0xff] %vm268_vm10, %v1160_v40  ;;  %1924 = vmatpush3.msra.mxu0 %v1742_v19  ;;  %v1740_v42 = vld [vmem:[%s2737_s8 + $0x18] sm:$0xff] }
 0x25e   :  { %v1173_v49 = vmul.f32 %v1169_v1, %v1160_v40  ;;  %v1178_v50 = vld [vmem:[#allocation3 + $0x38] sm:$0xff]  ;;  %v1223_v27 = vld [vmem:[#allocation3 + $0x70] sm:$0xff] }
 0x25f   :  { %1139 = vst.msk [vmem:[#allocation3 + $0xb0] sm:$0xff] %vm268_vm10, %v1122_v46  ;;  %1136 = vst.msk [vmem:[#allocation3 + $0x78] sm:$0xff] %vm268_vm10, %v1119_v47  ;;  %v1204_v51 = vadd.f32 %v1200_v35, %v1195_v33  ;;  %1731 = vrot.lane.b32.xlu1 %v1726_v53, %s2104_s5  ;;  %v1283_v1 = vld [vmem:[#allocation2 + $0xd0] sm:$0xff]  ;;  %v1738_v53 = vld [vmem:[%s2737_s8 + $0x8] sm:$0xff] }
 0x260   :  { %v1182_v52 = vadd.f32 %v1178_v50, %v1173_v49  ;;  %v1005_v15 = vpop.permute.xlu0 %1004  ;;  %v985_v38 = vpop.permute.xlu1 %984  ;;  %1729 = vrot.lane.b32.xlu0 %v1725_v31, %s2104_s5  ;;  %v1495_v46 = vld [vmem:[#allocation4 + $0x10] sm:$0xff] }
 0x261   :  { %v1124_v18 = vmul.f32 %v1099_v44, %v1005_v15  ;;  %v1121_v10 = vmul.f32 %v1091_v8, %v985_v38  ;;  %1209 = vst.msk [vmem:[#allocation4 + $0x50] sm:$0xff] %vm268_vm10, %v1204_v51  ;;  %v1218_v43 = vmul.f32 %v1214_v48, %v1204_v51  ;;  %v1739_v35 = vld [vmem:[%s2737_s8 + $0x10] sm:$0xff]  ;;  %v1284_v48 = vld [vmem:[#allocation2 + $0xd8] sm:$0xff] }
 0x262   :  { %1187 = vst.msk [vmem:[#allocation4 + $0x38] sm:$0xff] %vm268_vm10, %v1182_v52  ;;  %v1196_v24 = vmul.f32 %v1192_v14, %v1182_v52  ;;  %v1201_v54 = vld [vmem:[#allocation3 + $0x58] sm:$0xff]  ;;  %v1246_v8 = vld [vmem:[#allocation3 + $0x90] sm:$0xff] }
 0x263   :  { %1141 = vst.msk [vmem:[#allocation3 + $0xd0] sm:$0xff] %vm268_vm10, %v1124_v18  ;;  %1138 = vst.msk [vmem:[#allocation3 + $0x98] sm:$0xff] %vm268_vm10, %v1121_v10  ;;  %v1227_v23 = vadd.f32 %v1223_v27, %v1218_v43  ;;  %v1306_v14 = vld [vmem:[#allocation2 + $0xf0] sm:$0xff] }
 0x264   :  { %v1205_v28 = vadd.f32 %v1201_v54, %v1196_v24  ;;  %v1017_v55 = vpop.permute.xlu0 %1016  ;;  %v997_v56 = vpop.permute.xlu1 %996  ;;  %v1496_v38 = vld [vmem:[#allocation4 + $0x18] sm:$0xff]  ;;  %v1737_v24 = vld [vmem:[%s2737_s8] sm:$0xff] }
 0x265   :  { %v1126_v61 = vmul.f32 %v1103_v20, %v1017_v55  ;;  %v1123_v62 = vmul.f32 %v1095_v58, %v997_v56  ;;  %1232 = vst.msk [vmem:[#allocation4 + $0x70] sm:$0xff] %vm268_vm10, %v1227_v23  ;;  %v1241_v63 = vmul.f32 %v1237_v57, %v1227_v23  ;;  %v1741_v58 = vld [vmem:[%s2737_s8 + $0x20] sm:$0xff]  ;;  %v1497_v23 = vld [vmem:[#allocation4 + $0x30] sm:$0xff] }
 0x266   :  { %1210 = vst.msk [vmem:[#allocation4 + $0x58] sm:$0xff] %vm268_vm10, %v1205_v28  ;;  %v1219_v0 = vmul.f32 %v1215_v59, %v1205_v28  ;;  %v1224_v9 = vld [vmem:[#allocation3 + $0x78] sm:$0xff]  ;;  %v1269_v34 = vld [vmem:[#allocation3 + $0xb0] sm:$0xff]  ;;  %1925 = vmatprep.subr.mxu0 %v1741_v58 }
 0x267   :  { %1143 = vst.msk [vmem:[#allocation3 + $0xf0] sm:$0xff] %vm268_vm10, %v1126_v61  ;;  %1140 = vst.msk [vmem:[#allocation3 + $0xb8] sm:$0xff] %vm268_vm10, %v1123_v62  ;;  %v1250_v12 = vadd.f32 %v1246_v8, %v1241_v63  ;;  %1926 = vmatpush3.msra.mxu0 %v1741_v58 }
 0x268   :  { %v1228_v11 = vadd.f32 %v1224_v9, %v1219_v0  ;;  %v1514_v21 = vpop.permute.xlu0 %1513  ;;  %v1009_v22 = vpop.permute.xlu1 %1008  ;;  %1927 = vmatprep.subr.mxu0 %v1740_v42  ;;  %v1307_v0 = vld [vmem:[#allocation2 + $0xf8] sm:$0xff] }
 0x269   :  { %v1125_v17 = vmul.f32 %v1099_v44, %v1009_v22  ;;  %1255 = vst.msk [vmem:[#allocation4 + $0x90] sm:$0xff] %vm268_vm10, %v1250_v12  ;;  %v1264_v30 = vmul.f32 %v1260_v25, %v1250_v12  ;;  %v1575_v7 = vmul.f32 %v1514_v21, %v1495_v46  ;;  %1928 = vmatpush3.msra.mxu0 %v1740_v42  ;;  %v1498_v63 = vld [vmem:[#allocation4 + $0x38] sm:$0xff] }
 0x26a   :  { %1233 = vst.msk [vmem:[#allocation4 + $0x78] sm:$0xff] %vm268_vm10, %v1228_v11  ;;  %v1242_v26 = vmul.f32 %v1238_v32, %v1228_v11  ;;  %v1247_v39 = vld [vmem:[#allocation3 + $0x98] sm:$0xff]  ;;  %v1292_v50 = vld [vmem:[#allocation3 + $0xd0] sm:$0xff]  ;;  %1929 = vmatprep.subr.mxu0 %v1739_v35 }
 0x26b   :  { %1142 = vst.msk [vmem:[#allocation3 + $0xd8] sm:$0xff] %vm268_vm10, %v1125_v17  ;;  %v1273_v40 = vadd.f32 %v1269_v34, %v1264_v30  ;;  %1930 = vmatpush3.msra.mxu0 %v1739_v35  ;;  %v1591_v54 = vsel %vm268_vm10, %v1575_v7, 0.0  ;;  %v1499_v11 = vld [vmem:[#allocation4 + $0x50] sm:$0xff] }
 0x26c   :  { %v1251_v41 = vadd.f32 %v1247_v39, %v1242_v26  ;;  %v1522_v13 = vpop.permute.xlu0 %1521  ;;  %v1021_v37 = vpop.permute.xlu1 %1020  ;;  %1931 = vmatprep.subr.mxu0 %v1738_v53  ;;  %v1501_v34 = vld [vmem:[#allocation4 + $0x70] sm:$0xff] }
 0x26d   :  { %v1127_v47 = vmul.f32 %v1103_v20, %v1021_v37  ;;  %1278 = vst.msk [vmem:[#allocation4 + $0xb0] sm:$0xff] %vm268_vm10, %v1273_v40  ;;  %v1287_v33 = vmul.f32 %v1283_v1, %v1273_v40  ;;  %v1577_v28 = vmul.f32 %v1522_v13, %v1497_v23  ;;  %1932 = vmatpush3.msra.mxu0 %v1738_v53  ;;  %v1500_v26 = vld [vmem:[#allocation4 + $0x58] sm:$0xff] }
 0x26e   :  { %1256 = vst.msk [vmem:[#allocation4 + $0x98] sm:$0xff] %vm268_vm10, %v1251_v41  ;;  %v1265_v49 = vmul.f32 %v1261_v45, %v1251_v41  ;;  %v1270_v44 = vld [vmem:[#allocation3 + $0xb8] sm:$0xff]  ;;  %v1315_v27 = vld [vmem:[#allocation3 + $0xf0] sm:$0xff]  ;;  %1933 = vmatprep.subr.mxu0 %v1737_v24 }
 0x26f   :  { %1144 = vst.msk [vmem:[#allocation3 + $0xf8] sm:$0xff] %vm268_vm10, %v1127_v47  ;;  %v1296_v51 = vadd.f32 %v1292_v50, %v1287_v33  ;;  %1934 = vmatpush3.msra.mxu0 %v1737_v24  ;;  %v1600_v12 = vsel %vm268_vm10, %v1577_v28, 0.0 }
 0x270   :  { %v1274_v52 = vadd.f32 %v1270_v44, %v1265_v49  ;;  %v1530_v31 = vpop.permute.xlu0 %1529  ;;  %v1518_v15 = vpop.permute.xlu1 %1517  ;;  %v1503_v44 = vld [vmem:[#allocation4 + $0x90] sm:$0xff] }
 0x271   :  { %v1576_v18 = vmul.f32 %v1518_v15, %v1496_v38  ;;  %1301 = vst.msk [vmem:[#allocation4 + $0xd0] sm:$0xff] %vm268_vm10, %v1296_v51  ;;  %v1310_v43 = vmul.f32 %v1306_v14, %v1296_v51  ;;  %v1579_v22 = vmul.f32 %v1530_v31, %v1499_v11  ;;  %v1502_v33 = vld [vmem:[#allocation4 + $0x78] sm:$0xff] }
 0x272   :  { %1279 = vst.msk [vmem:[#allocation4 + $0xb8] sm:$0xff] %vm268_vm10, %v1274_v52  ;;  %v1288_v10 = vmul.f32 %v1284_v48, %v1274_v52  ;;  %v1293_v20 = vld [vmem:[#allocation3 + $0xd8] sm:$0xff] }
 0x273   :  { %v1592_v55 = vsel %vm268_vm10, %v1576_v18, 0.0  ;;  %v1319_v57 = vadd.f32 %v1315_v27, %v1310_v43  ;;  %v1609_v42 = vsel %vm268_vm10, %v1579_v22, 0.0 }
 0x274   :  { %v1297_v56 = vadd.f32 %v1293_v20, %v1288_v10  ;;  %v1593_v59 = vadd.f32 %v1592_v55, %v1591_v54  ;;  %v1538_v61 = vpop.permute.xlu0 %1537  ;;  %v1526_v62 = vpop.permute.xlu1 %1525 }
 0x275   :  { %v1578_v36 = vmul.f32 %v1526_v62, %v1498_v63  ;;  %1324 = vst.msk [vmem:[#allocation4 + $0xf0] sm:$0xff] %vm268_vm10, %v1319_v57  ;;  %v1581_v41 = vmul.f32 %v1538_v61, %v1501_v34  ;;  %v1504_v14 = vld [vmem:[#allocation4 + $0x98] sm:$0xff] }
 0x276   :  { %1302 = vst.msk [vmem:[#allocation4 + $0xd8] sm:$0xff] %vm268_vm10, %v1297_v56  ;;  %v1311_v29 = vmul.f32 %v1307_v0, %v1297_v56  ;;  %v1316_v8 = vld [vmem:[#allocation3 + $0xf8] sm:$0xff]  ;;  %v1594_v9 = vrot.slane %v1593_v59, 4  ;;  %v1505_v56 = vld [vmem:[#allocation4 + $0xb0] sm:$0xff] }
 0x277   :  { %v1601_v19 = vsel %vm268_vm10, %v1578_v36, 0.0  ;;  %v1618_v50 = vsel %vm268_vm10, %v1581_v41, 0.0 }
 0x278   :  { %v1320_v21 = vadd.f32 %v1316_v8, %v1311_v29  ;;  %v1595_v25 = vadd.f32 %v1594_v9, %v1593_v59  ;;  %v1602_v32 = vadd.f32 %v1601_v19, %v1600_v12  ;;  %v1546_v17 = vpop.permute.xlu0 %1545  ;;  %v1534_v30 = vpop.permute.xlu1 %1533  ;;  %v702_v12 = vrot.slane %v2486_v60, %v2267_v6 }
 0x279   :  { %v1580_v40 = vmul.f32 %v1534_v30, %v1500_v26  ;;  %v1583_v53 = vmul.f32 %v1546_v17, %v1503_v44  ;;  %v1506_v8 = vld [vmem:[#allocation4 + $0xb8] sm:$0xff]  ;;  %v1145_v44 = vld [vmem:[#allocation2] sm:$0xff] }
 0x27a   :  { %1325 = vst.msk [vmem:[#allocation4 + $0xf8] sm:$0xff] %vm268_vm10, %v1320_v21  ;;  %v1596_v58 = vrot.slane %v1595_v25, 2  ;;  %v1603_v39 = vrot.slane %v1602_v32, 4  ;;  %v1507_v21 = vld [vmem:[#allocation4 + $0xd0] sm:$0xff] }
 0x27b   :  { %v1610_v1 = vsel %vm268_vm10, %v1580_v40, 0.0  ;;  %v1627_v23 = vsel %vm268_vm10, %v1583_v53, 0.0 }
 0x27c   :  { %v1597_v13 = vadd.f32 %v1596_v58, %v1595_v25  ;;  %v1604_v37 = vadd.f32 %v1603_v39, %v1602_v32  ;;  %v1554_v45 = vpop.permute.xlu0 %1553  ;;  %v1611_v46 = vadd.f32 %v1610_v1, %v1609_v42 }
 0x27d   :  { %v1542_v47 = vpop.permute.xlu1 %1541  ;;  %v1585_v62 = vmul.f32 %v1554_v45, %v1505_v56  ;;  %v1508_v42 = vld [vmem:[#allocation4 + $0xd8] sm:$0xff] }
 0x27e   :  { %v1605_v49 = vrot.slane %v1604_v37, 2  ;;  %v1582_v35 = vmul.f32 %v1542_v47, %v1502_v33  ;;  %v1612_v7 = vrot.slane %v1611_v46, 4  ;;  %v1598_v51 = vrot.slane %v1597_v13, 1 }
 0x27f   :  { %v1636_v32 = vsel %vm268_vm10, %v1585_v62, 0.0  ;;  %v706_v33 = vrot.slane %v2492_v2, %v2267_v6  ;;  %v697_v62 = vcombine.high %v2492_v2, %v2492_v2 }
 0x280   :  { %v1606_v52 = vadd.f32 %v1605_v49, %v1604_v37  ;;  %v1619_v31 = vsel %vm268_vm10, %v1582_v35, 0.0  ;;  %v1613_v15 = vadd.f32 %v1612_v7, %v1611_v46  ;;  %v1562_v10 = vpop.permute.xlu0 %1561  ;;  %v1599_v54 = vadd.f32 %v1598_v51, %v1597_v13 }
 0x281   :  { %v1620_v38 = vadd.f32 %v1619_v31, %v1618_v50  ;;  %v1550_v48 = vpop.permute.xlu1 %1549  ;;  %v1587_v17 = vmul.f32 %v1562_v10, %v1507_v21  ;;  %v1146_v10 = vld [vmem:[#allocation2 + $0x8] sm:$0xff]  ;;  %v714_v2 = vrot.slane %v697_v62, %v2267_v6 }
 0x282   :  { %v1607_v18 = vrot.slane %v1606_v52, 1  ;;  %v1584_v43 = vmul.f32 %v1550_v48, %v1504_v14  ;;  %v1614_v24 = vrot.slane %v1613_v15, 2 }
 0x283   :  { %v1621_v27 = vrot.slane %v1620_v38, 4  ;;  %v1645_v49 = vsel %vm268_vm10, %v1587_v17, 0.0 }
 0x284   :  { %v1608_v20 = vadd.f32 %v1607_v18, %v1606_v52  ;;  %v1628_v28 = vsel %vm268_vm10, %v1584_v43, 0.0  ;;  %v1615_v55 = vadd.f32 %v1614_v24, %v1613_v15  ;;  %v560_v9 = vpop.permute.xlu0 %559  ;;  %v1149_v43 = vmul.f32 0.0, %v1145_v44 }
 0x285   :  { %v1622_v57 = vadd.f32 %v1621_v27, %v1620_v38  ;;  %v1629_v59 = vadd.f32 %v1628_v28, %v1627_v23  ;;  %v1558_v29 = vpop.permute.xlu1 %1557  ;;  %v739_v30 = vmul.f32 %v702_v12, %v560_v9  ;;  %v695_v27 = vcombine.high %v2486_v60, %v2486_v60  ;;  %v1166_v9 = vld [vmem:[#allocation2 + $0x20] sm:$0xff] }
 0x286   :  { %v1694_v61 = vsel %vm1671_vm15, %v1608_v20, %v1599_v54  ;;  %v1616_v63 = vrot.slane %v1615_v55, 1  ;;  %v1586_v25 = vmul.f32 %v1558_v29, %v1506_v8  ;;  %v1167_v8 = vld [vmem:[#allocation2 + $0x28] sm:$0xff] }
 0x287   :  { %v1623_v0 = vrot.slane %v1622_v57, 2  ;;  %v1630_v36 = vrot.slane %v1629_v59, 4  ;;  %755 = vst.msk [vmem:[#allocation3] sm:$0xff] %vm268_vm10, %v739_v30 }
 0x288   :  { %v1617_v11 = vadd.f32 %v1616_v63, %v1615_v55  ;;  %v1637_v39 = vsel %vm268_vm10, %v1586_v25, 0.0  ;;  %v564_v13 = vpop.permute.xlu0 %563  ;;  %v1150_v55 = vmul.f32 0.0, %v1146_v10 }
 0x289   :  { %v1624_v19 = vadd.f32 %v1623_v0, %v1622_v57  ;;  %v1631_v22 = vadd.f32 %v1630_v36, %v1629_v59  ;;  %v1638_v40 = vadd.f32 %v1637_v39, %v1636_v32  ;;  %v1566_v41 = vpop.permute.xlu1 %1565  ;;  %v740_v46 = vmul.f32 %v702_v12, %v564_v13  ;;  %v1189_v13 = vld [vmem:[#allocation2 + $0x40] sm:$0xff] }
 0x28a   :  { %v1695_v26 = vsel %vm1673_vm1, %v1617_v11, %v1694_v61  ;;  %v1588_v45 = vmul.f32 %v1566_v41, %v1508_v42  ;;  %v710_v61 = vrot.slane %v695_v27, %v2267_v6  ;;  %v1190_v42 = vld [vmem:[#allocation2 + $0x48] sm:$0xff] }
 0x28b   :  { %v1625_v58 = vrot.slane %v1624_v19, 1  ;;  %v1632_v34 = vrot.slane %v1631_v22, 2  ;;  %v1639_v47 = vrot.slane %v1638_v40, 4  ;;  %756 = vst.msk [vmem:[#allocation3 + $0x8] sm:$0xff] %vm268_vm10, %v740_v46 }
 0x28c   :  { %v1646_v50 = vsel %vm268_vm10, %v1588_v45, 0.0  ;;  %v572_v31 = vpop.permute.xlu0 %571 }
 0x28d   :  { %v1626_v37 = vadd.f32 %v1625_v58, %v1624_v19  ;;  %v1633_v1 = vadd.f32 %v1632_v34, %v1631_v22  ;;  %v1640_v51 = vadd.f32 %v1639_v47, %v1638_v40  ;;  %v1647_v52 = vadd.f32 %v1646_v50, %v1645_v49  ;;  %v576_v53 = vpop.permute.xlu1 %575 }
 0x28e   :  { %v742_v38 = vmul.f32 %v706_v33, %v576_v53  ;;  %v741_v48 = vmul.f32 %v706_v33, %v572_v31  ;;  %v1153_v24 = vld [vmem:[#allocation3] sm:$0xff] }
 0x28f   :  { %v1634_v35 = vrot.slane %v1633_v1, 1  ;;  %v1696_v7 = vsel %vm1675_vm2, %v1626_v37, %v1695_v26  ;;  %v1641_v14 = vrot.slane %v1640_v51, 2  ;;  %v1648_v18 = vrot.slane %v1647_v52, 4 }
 0x290   :  { %758 = vst.msk [vmem:[#allocation3 + $0x28] sm:$0xff] %vm268_vm10, %v742_v38  ;;  %757 = vst.msk [vmem:[#allocation3 + $0x20] sm:$0xff] %vm268_vm10, %v741_v48  ;;  %v1157_v28 = vadd.f32 %v1153_v24, %v1149_v43  ;;  %v1213_v38 = vld [vmem:[#allocation2 + $0x68] sm:$0xff]  ;;  %v1212_v48 = vld [vmem:[#allocation2 + $0x60] sm:$0xff] }
 0x291   :  { %v1635_v15 = vadd.f32 %v1634_v35, %v1633_v1  ;;  %v1642_v20 = vadd.f32 %v1641_v14, %v1640_v51  ;;  %v1649_v23 = vadd.f32 %v1648_v18, %v1647_v52  ;;  %v718_v1 = vrot.slane %v2496_v3, %v2267_v6 }
 0x292   :  { %v1154_v59 = vld [vmem:[#allocation3 + $0x8] sm:$0xff]  ;;  %1161 = vst.msk [vmem:[#allocation4] sm:$0xff] %vm268_vm10, %v1157_v28  ;;  %v1170_v21 = vmul.f32 %v1166_v9, %v1157_v28  ;;  %v696_v51 = vcombine.high %v2496_v3, %v2496_v3 }
 0x293   :  { %v1697_v54 = vsel %vm1677_vm3, %v1635_v15, %v1696_v7  ;;  %v1643_v56 = vrot.slane %v1642_v20, 1  ;;  %v1650_v57 = vrot.slane %v1649_v23, 2  ;;  %v1158_v63 = vadd.f32 %v1154_v59, %v1150_v55 }
 0x294   :  { %v722_v7 = vrot.slane %v2503_v16, %v2267_v6  ;;  %v726_v3 = vrot.slane %v696_v51, %v2267_v6 }
 0x295   :  { %v1644_v0 = vadd.f32 %v1643_v56, %v1642_v20  ;;  %v1651_v60 = vadd.f32 %v1650_v57, %v1649_v23  ;;  %v588_v36 = vpop.permute.xlu1 %587  ;;  %1162 = vst.msk [vmem:[#allocation4 + $0x8] sm:$0xff] %vm268_vm10, %v1158_v63  ;;  %v1171_v19 = vmul.f32 %v1167_v8, %v1158_v63  ;;  %v1236_v56 = vld [vmem:[#allocation2 + $0x88] sm:$0xff]  ;;  %v1235_v57 = vld [vmem:[#allocation2 + $0x80] sm:$0xff] }
 0x296   :  { %v584_v29 = vpop.permute.xlu0 %583  ;;  %v744_v12 = vmul.f32 %v710_v61, %v588_v36 }
 0x297   :  { %v743_v11 = vmul.f32 %v710_v61, %v584_v29  ;;  %v1652_v22 = vrot.slane %v1651_v60, 1  ;;  %v1176_v25 = vld [vmem:[#allocation3 + $0x28] sm:$0xff]  ;;  %v1175_v32 = vld [vmem:[#allocation3 + $0x20] sm:$0xff]  ;;  %v1698_v17 = vsel %vm1679_vm4, %v1644_v0, %v1697_v54  ;;  %v698_v54 = vcombine.high %v2503_v16, %v2503_v16 }
 0x298   :  { %760 = vst.msk [vmem:[#allocation3 + $0x48] sm:$0xff] %vm268_vm10, %v744_v12  ;;  %v1180_v30 = vadd.f32 %v1176_v25, %v1171_v19  ;;  %v1179_v26 = vadd.f32 %v1175_v32, %v1170_v21  ;;  %v1259_v12 = vld [vmem:[#allocation2 + $0xa8] sm:$0xff] }
 0x299   :  { %759 = vst.msk [vmem:[#allocation3 + $0x40] sm:$0xff] %vm268_vm10, %v743_v11  ;;  %v1653_v58 = vadd.f32 %v1652_v22, %v1651_v60  ;;  %v600_v34 = vpop.permute.xlu1 %599  ;;  %v730_v16 = vrot.slane %v698_v54, %v2267_v6  ;;  %v1258_v11 = vld [vmem:[#allocation2 + $0xa0] sm:$0xff] }
 0x29a   :  { %v596_v39 = vpop.permute.xlu0 %595  ;;  %v746_v40 = vmul.f32 %v714_v2, %v600_v34  ;;  %1185 = vst.msk [vmem:[#allocation4 + $0x28] sm:$0xff] %vm268_vm10, %v1180_v30  ;;  %1184 = vst.msk [vmem:[#allocation4 + $0x20] sm:$0xff] %vm268_vm10, %v1179_v26  ;;  %v1194_v45 = vmul.f32 %v1190_v42, %v1180_v30  ;;  %v1193_v46 = vmul.f32 %v1189_v13, %v1179_v26  ;;  %v1281_v34 = vld [vmem:[#allocation2 + $0xc0] sm:$0xff] }
 0x29b   :  { %v745_v41 = vmul.f32 %v714_v2, %v596_v39  ;;  %v2655_v37 = vsel %vm1681_vm5, %v1653_v58, %v1698_v17  ;;  %v1282_v58 = vld [vmem:[#allocation2 + $0xc8] sm:$0xff] }
 0x29c   :  { %762 = vst.msk [vmem:[#allocation3 + $0x68] sm:$0xff] %vm268_vm10, %v746_v40 }
 0x29d   :  { %761 = vst.msk [vmem:[#allocation3 + $0x60] sm:$0xff] %vm268_vm10, %v745_v41  ;;  %v612_v47 = vpop.permute.xlu1 %611 }
 0x29e   :  { %v608_v33 = vpop.permute.xlu0 %607  ;;  %v748_v49 = vmul.f32 %v718_v1, %v612_v47 }
 0x29f   :  { %v747_v35 = vmul.f32 %v718_v1, %v608_v33  ;;  %v1199_v50 = vld [vmem:[#allocation3 + $0x48] sm:$0xff] }
 0x2a0   :  { %v1198_v44 = vld [vmem:[#allocation3 + $0x40] sm:$0xff]  ;;  %764 = vst.msk [vmem:[#allocation3 + $0x88] sm:$0xff] %vm268_vm10, %v748_v49  ;;  %v1203_v52 = vadd.f32 %v1199_v50, %v1194_v45  ;;  %v1327_v50 = vld [vmem:[#allocation4 + $0x8] sm:$0xff] }
 0x2a1   :  { %763 = vst.msk [vmem:[#allocation3 + $0x80] sm:$0xff] %vm268_vm10, %v747_v35  ;;  %v1202_v53 = vadd.f32 %v1198_v44, %v1193_v46  ;;  %v624_v31 = vpop.permute.xlu1 %623  ;;  %v1304_v45 = vld [vmem:[#allocation2 + $0xe0] sm:$0xff]  ;;  %v1329_v47 = vld [vmem:[#allocation4 + $0x28] sm:$0xff] }
 0x2a2   :  { %v620_v15 = vpop.permute.xlu0 %619  ;;  %v750_v14 = vmul.f32 %v722_v7, %v624_v31  ;;  %1208 = vst.msk [vmem:[#allocation4 + $0x48] sm:$0xff] %vm268_vm10, %v1203_v52  ;;  %v1217_v10 = vmul.f32 %v1213_v38, %v1203_v52  ;;  %v1328_v49 = vld [vmem:[#allocation4 + $0x20] sm:$0xff]  ;;  %v1305_v35 = vld [vmem:[#allocation2 + $0xe8] sm:$0xff] }
 0x2a3   :  { %v749_v18 = vmul.f32 %v722_v7, %v620_v15  ;;  %1207 = vst.msk [vmem:[#allocation4 + $0x40] sm:$0xff] %vm268_vm10, %v1202_v53  ;;  %v1216_v43 = vmul.f32 %v1212_v48, %v1202_v53  ;;  %v1222_v24 = vld [vmem:[#allocation3 + $0x68] sm:$0xff]  ;;  %v1326_v44 = vld [vmem:[#allocation4] sm:$0xff] }
 0x2a4   :  { %v1221_v27 = vld [vmem:[#allocation3 + $0x60] sm:$0xff]  ;;  %766 = vst.msk [vmem:[#allocation3 + $0xa8] sm:$0xff] %vm268_vm10, %v750_v14  ;;  %v1226_v20 = vadd.f32 %v1222_v24, %v1217_v10 }
 0x2a5   :  { %765 = vst.msk [vmem:[#allocation3 + $0xa0] sm:$0xff] %vm268_vm10, %v749_v18  ;;  %v1225_v23 = vadd.f32 %v1221_v27, %v1216_v43  ;;  %v636_v28 = vpop.permute.xlu1 %635 }
 0x2a6   :  { %v632_v55 = vpop.permute.xlu0 %631  ;;  %v752_v59 = vmul.f32 %v726_v3, %v636_v28  ;;  %1231 = vst.msk [vmem:[#allocation4 + $0x68] sm:$0xff] %vm268_vm10, %v1226_v20  ;;  %v1240_v62 = vmul.f32 %v1236_v56, %v1226_v20 }
 0x2a7   :  { %v751_v61 = vmul.f32 %v726_v3, %v632_v55  ;;  %1230 = vst.msk [vmem:[#allocation4 + $0x60] sm:$0xff] %vm268_vm10, %v1225_v23  ;;  %v1239_v63 = vmul.f32 %v1235_v57, %v1225_v23  ;;  %v1245_v0 = vld [vmem:[#allocation3 + $0x88] sm:$0xff] }
 0x2a8   :  { %v1244_v60 = vld [vmem:[#allocation3 + $0x80] sm:$0xff]  ;;  %768 = vst.msk [vmem:[#allocation3 + $0xc8] sm:$0xff] %vm268_vm10, %v752_v59  ;;  %v1249_v36 = vadd.f32 %v1245_v0, %v1240_v62 }
 0x2a9   :  { %767 = vst.msk [vmem:[#allocation3 + $0xc0] sm:$0xff] %vm268_vm10, %v751_v61  ;;  %v1248_v29 = vadd.f32 %v1244_v60, %v1239_v63  ;;  %v648_v8 = vpop.permute.xlu1 %647  ;;  %v1331_v27 = vld [vmem:[#allocation4 + $0x48] sm:$0xff] }
 0x2aa   :  { %v644_v9 = vpop.permute.xlu0 %643  ;;  %v754_v19 = vmul.f32 %v730_v16, %v648_v8  ;;  %1254 = vst.msk [vmem:[#allocation4 + $0x88] sm:$0xff] %vm268_vm10, %v1249_v36  ;;  %v1263_v22 = vmul.f32 %v1259_v12, %v1249_v36  ;;  %v1330_v54 = vld [vmem:[#allocation4 + $0x40] sm:$0xff] }
 0x2ab   :  { %v753_v21 = vmul.f32 %v730_v16, %v644_v9  ;;  %1253 = vst.msk [vmem:[#allocation4 + $0x80] sm:$0xff] %vm268_vm10, %v1248_v29  ;;  %v1262_v25 = vmul.f32 %v1258_v11, %v1248_v29  ;;  %v1268_v32 = vld [vmem:[#allocation3 + $0xa8] sm:$0xff] }
 0x2ac   :  { %v1267_v17 = vld [vmem:[#allocation3 + $0xa0] sm:$0xff]  ;;  %770 = vst.msk [vmem:[#allocation3 + $0xe8] sm:$0xff] %vm268_vm10, %v754_v19  ;;  %v1272_v6 = vadd.f32 %v1268_v32, %v1263_v22 }
 0x2ad   :  { %769 = vst.msk [vmem:[#allocation3 + $0xe0] sm:$0xff] %vm268_vm10, %v753_v21  ;;  %v1271_v2 = vadd.f32 %v1267_v17, %v1262_v25  ;;  %v1349_v30 = vpop.permute.xlu1 %1348  ;;  %v1333_v62 = vld [vmem:[#allocation4 + $0x68] sm:$0xff] }
 0x2ae   :  { %v1345_v26 = vpop.permute.xlu0 %1344  ;;  %1277 = vst.msk [vmem:[#allocation4 + $0xa8] sm:$0xff] %vm268_vm10, %v1272_v6  ;;  %v1286_v39 = vmul.f32 %v1282_v58, %v1272_v6  ;;  %v1407_v38 = vmul.f32 %v1349_v30, %v1327_v50  ;;  %v1332_v0 = vld [vmem:[#allocation4 + $0x60] sm:$0xff] }
 0x2af   :  { %1276 = vst.msk [vmem:[#allocation4 + $0xa0] sm:$0xff] %vm268_vm10, %v1271_v2  ;;  %v1285_v40 = vmul.f32 %v1281_v34, %v1271_v2  ;;  %v1291_v41 = vld [vmem:[#allocation3 + $0xc8] sm:$0xff]  ;;  %v1406_v48 = vmul.f32 %v1345_v26, %v1326_v44 }
 0x2b0   :  { %v1290_v42 = vld [vmem:[#allocation3 + $0xc0] sm:$0xff]  ;;  %v1295_v13 = vadd.f32 %v1291_v41, %v1286_v39  ;;  %v1423_v28 = vsel %vm268_vm10, %v1407_v38, 0.0 }
 0x2b1   :  { %v1294_v1 = vadd.f32 %v1290_v42, %v1285_v40  ;;  %v1357_v46 = vpop.permute.xlu1 %1356  ;;  %v1422_v55 = vsel %vm268_vm10, %v1406_v48, 0.0  ;;  %v1335_v21 = vld [vmem:[#allocation4 + $0x88] sm:$0xff] }
 0x2b2   :  { %v1353_v33 = vpop.permute.xlu0 %1352  ;;  %v1409_v7 = vmul.f32 %v1357_v46, %v1329_v47  ;;  %1300 = vst.msk [vmem:[#allocation4 + $0xc8] sm:$0xff] %vm268_vm10, %v1295_v13  ;;  %v1309_v52 = vmul.f32 %v1305_v35, %v1295_v13  ;;  %v1424_v60 = vadd.f32 %v1423_v28, %v1422_v55  ;;  %v1334_v25 = vld [vmem:[#allocation4 + $0x80] sm:$0xff] }
 0x2b3   :  { %v1408_v51 = vmul.f32 %v1353_v33, %v1328_v49  ;;  %1299 = vst.msk [vmem:[#allocation4 + $0xc0] sm:$0xff] %vm268_vm10, %v1294_v1  ;;  %v1308_v53 = vmul.f32 %v1304_v45, %v1294_v1  ;;  %v1314_v31 = vld [vmem:[#allocation3 + $0xe8] sm:$0xff] }
 0x2b4   :  { %v1313_v15 = vld [vmem:[#allocation3 + $0xe0] sm:$0xff]  ;;  %v1318_v14 = vadd.f32 %v1314_v31, %v1309_v52  ;;  %v1432_v10 = vsel %vm268_vm10, %v1409_v7, 0.0  ;;  %v1425_v32 = vrot.slane %v1424_v60, 4 }
 0x2b5   :  { %v1317_v18 = vadd.f32 %v1313_v15, %v1308_v53  ;;  %v1431_v43 = vsel %vm268_vm10, %v1408_v51, 0.0  ;;  %v1365_v24 = vpop.permute.xlu1 %1364  ;;  %v1337_v41 = vld [vmem:[#allocation4 + $0xa8] sm:$0xff] }
 0x2b6   :  { %v1361_v3 = vpop.permute.xlu0 %1360  ;;  %v1411_v20 = vmul.f32 %v1365_v24, %v1331_v27  ;;  %1323 = vst.msk [vmem:[#allocation4 + $0xe8] sm:$0xff] %vm268_vm10, %v1318_v14  ;;  %v1433_v56 = vadd.f32 %v1432_v10, %v1431_v43  ;;  %v1336_v13 = vld [vmem:[#allocation4 + $0xa0] sm:$0xff]  ;;  %v1426_v1 = vadd.f32 %v1425_v32, %v1424_v60 }
 0x2b7   :  { %v1410_v23 = vmul.f32 %v1361_v3, %v1330_v54  ;;  %1322 = vst.msk [vmem:[#allocation4 + $0xe0] sm:$0xff] %vm268_vm10, %v1317_v18 }
 0x2b8   :  { %v1441_v57 = vsel %vm268_vm10, %v1411_v20, 0.0  ;;  %v1434_v8 = vrot.slane %v1433_v56, 4  ;;  %v1427_v38 = vrot.slane %v1426_v1, 2 }
 0x2b9   :  { %v1440_v59 = vsel %vm268_vm10, %v1410_v23, 0.0  ;;  %v1373_v61 = vpop.permute.xlu1 %1372  ;;  %v1339_v53 = vld [vmem:[#allocation4 + $0xc8] sm:$0xff] }
 0x2ba   :  { %v1369_v63 = vpop.permute.xlu0 %1368  ;;  %v1442_v16 = vadd.f32 %v1441_v57, %v1440_v59  ;;  %v1413_v36 = vmul.f32 %v1373_v61, %v1333_v62  ;;  %v1435_v26 = vadd.f32 %v1434_v8, %v1433_v56  ;;  %v1338_v15 = vld [vmem:[#allocation4 + $0xc0] sm:$0xff]  ;;  %v1428_v59 = vadd.f32 %v1427_v38, %v1426_v1 }
 0x2bb   :  { %v1412_v29 = vmul.f32 %v1369_v63, %v1332_v0 }
 0x2bc   :  { %v1450_v9 = vsel %vm268_vm10, %v1413_v36, 0.0  ;;  %v1443_v17 = vrot.slane %v1442_v16, 4  ;;  %v1436_v35 = vrot.slane %v1435_v26, 2 }
 0x2bd   :  { %v1449_v12 = vsel %vm268_vm10, %v1412_v29, 0.0  ;;  %v1381_v19 = vpop.permute.xlu1 %1380  ;;  %v1341_v55 = vld [vmem:[#allocation4 + $0xe8] sm:$0xff] }
 0x2be   :  { %v1451_v11 = vadd.f32 %v1450_v9, %v1449_v12  ;;  %v1377_v22 = vpop.permute.xlu0 %1376  ;;  %v1415_v6 = vmul.f32 %v1381_v19, %v1335_v21  ;;  %v1444_v45 = vadd.f32 %v1443_v17, %v1442_v16  ;;  %v1437_v24 = vadd.f32 %v1436_v35, %v1435_v26  ;;  %v1340_v57 = vld [vmem:[#allocation4 + $0xe0] sm:$0xff]  ;;  %v1510_v21 = vld [vmem:[#allocation4 + $0xf8] sm:$0xff] }
 0x2bf   :  { %v1414_v2 = vmul.f32 %v1377_v22, %v1334_v25  ;;  %v1509_v25 = vld [vmem:[#allocation4 + $0xf0] sm:$0xff]  ;;  %v1429_v17 = vrot.slane %v1428_v59, 1 }
 0x2c0   :  { %v1452_v30 = vrot.slane %v1451_v11, 4  ;;  %v1459_v58 = vsel %vm268_vm10, %v1415_v6, 0.0  ;;  %v1445_v48 = vrot.slane %v1444_v45, 2  ;;  %v1438_v36 = vrot.slane %v1437_v24, 1 }
 0x2c1   :  { %v1458_v34 = vsel %vm268_vm10, %v1414_v2, 0.0  ;;  %v1389_v40 = vpop.permute.xlu1 %1388 }
 0x2c2   :  { %v1460_v39 = vadd.f32 %v1459_v58, %v1458_v34  ;;  %v1385_v42 = vpop.permute.xlu0 %1384  ;;  %v1417_v46 = vmul.f32 %v1389_v40, %v1337_v41  ;;  %v1453_v33 = vadd.f32 %v1452_v30, %v1451_v11  ;;  %v1446_v61 = vadd.f32 %v1445_v48, %v1444_v45 }
 0x2c3   :  { %v1416_v47 = vmul.f32 %v1385_v42, %v1336_v13 }
 0x2c4   :  { %v1461_v49 = vrot.slane %v1460_v39, 4  ;;  %v1468_v50 = vsel %vm268_vm10, %v1417_v46, 0.0  ;;  %v1454_v10 = vrot.slane %v1453_v33, 2  ;;  %v1447_v6 = vrot.slane %v1446_v61, 1 }
 0x2c5   :  { %v1467_v44 = vsel %vm268_vm10, %v1416_v47, 0.0  ;;  %v1397_v52 = vpop.permute.xlu1 %1396  ;;  %v1430_v47 = vadd.f32 %v1429_v17, %v1428_v59 }
 0x2c6   :  { %v1462_v7 = vadd.f32 %v1461_v49, %v1460_v39  ;;  %v1469_v51 = vadd.f32 %v1468_v50, %v1467_v44  ;;  %v1393_v31 = vpop.permute.xlu0 %1392  ;;  %v1419_v14 = vmul.f32 %v1397_v52, %v1339_v53  ;;  %v1455_v0 = vadd.f32 %v1454_v10, %v1453_v33 }
 0x2c7   :  { %v1418_v18 = vmul.f32 %v1393_v31, %v1338_v15  ;;  %v1439_v39 = vadd.f32 %v1438_v36, %v1437_v24  ;;  %v1448_v33 = vadd.f32 %v1447_v6, %v1446_v61 }
 0x2c8   :  { %v1470_v43 = vrot.slane %v1469_v51, 4  ;;  %v1463_v27 = vrot.slane %v1462_v7, 2  ;;  %v1477_v3 = vsel %vm268_vm10, %v1419_v14, 0.0  ;;  %v1456_v26 = vrot.slane %v1455_v0, 1 }
 0x2c9   :  { %v1476_v54 = vsel %vm268_vm10, %v1418_v18, 0.0  ;;  %v1405_v28 = vpop.permute.xlu1 %1404  ;;  %v1858_v18 = vld [vmem:[%s2736_s7] ss:$0 sm:$0xff]  ;;  %s2105_s7 = smov [#allocation10]  }
 0x2ca   :  { %v1471_v20 = vadd.f32 %v1470_v43, %v1469_v51  ;;  %v1478_v23 = vadd.f32 %v1477_v3, %v1476_v54  ;;  %v1401_v56 = vpop.permute.xlu0 %1400  ;;  %v1421_v62 = vmul.f32 %v1405_v28, %v1341_v55  ;;  %v1464_v29 = vadd.f32 %v1463_v27, %v1462_v7  ;;  %s1833_s25 = sshll.u32 %s2105_s7, 4  ;;  %s1834_s25 = int_to_ptr.vmem [resolvable:$true] %s1833_s25 }
 0x2cb   :  { %v1420_v63 = vmul.f32 %v1401_v56, %v1340_v57  ;;  %v1457_v49 = vadd.f32 %v1456_v26, %v1455_v0  ;;  %v1672_v51 = vsel %vm1671_vm15, %v1439_v39, %v1430_v47  ;;  %v1709_v54 = vmul.f32 %v1858_v18, %v2258_v4  ;;  %s2073_s6 = scalar_lea.vmem %s1834_s25, 256  ;;  %p2078_p11 = scmp.lt.s32.totalorder %s1834_s25, %s1834_s25 }
 0x2cc   :  { %v1472_v60 = vrot.slane %v1471_v20, 2  ;;  %v1479_v16 = vrot.slane %v1478_v23, 4  ;;  %v1486_v8 = vsel %vm268_vm10, %v1421_v62, 0.0  ;;  %v1465_v40 = vrot.slane %v1464_v29, 1  ;;  %p2074_p10 = scmp.ne.s32.totalorder %s1834_s25, %s2073_s6  ;;  %p2079_p12 = scmp.lt.s32.totalorder %s2073_s6, %s2073_s6 }
 0x2cd   :  { %v1485_v9 = vsel %vm268_vm10, %v1420_v63, 0.0  ;;  %v1574_v22 = vpop.permute.xlu1 %1573  ;;  %v1674_v15 = vsel %vm1673_vm1, %v1448_v33, %v1672_v51  ;;  %v1710_v59 = vmul.f32 %v1858_v18, %v2260_v5 }
 0x2ce   :  { %v1473_v12 = vadd.f32 %v1472_v60, %v1471_v20  ;;  %v1480_v11 = vadd.f32 %v1479_v16, %v1478_v23  ;;  %v1487_v19 = vadd.f32 %v1486_v8, %v1485_v9  ;;  %v1570_v32 = vpop.permute.xlu0 %1569  ;;  %v1590_v2 = vmul.f32 %v1574_v22, %v1510_v21  ;;  %p2080_p13 = por %p2079_p12, %p2078_p11 }
 0x2cf   :  { %v1589_v30 = vmul.f32 %v1570_v32, %v1509_v25  ;;  %v1466_v7 = vadd.f32 %v1465_v40, %v1464_v29  ;;  %v1676_v10 = vsel %vm1675_vm2, %v1457_v49, %v1674_v15 }
 0x2d0   :  { %v1481_v58 = vrot.slane %v1480_v11, 2  ;;  %v1488_v34 = vrot.slane %v1487_v19, 4  ;;  %v1655_v41 = vsel %vm268_vm10, %v1590_v2, 0.0  ;;  %v1474_v13 = vrot.slane %v1473_v12, 1  ;;  %p2081_p0 = pnand %p2080_p13, %p2074_p10 }
 0x2d1   :  { %v1654_v42 = vsel %vm268_vm10, %v1589_v30, 0.0  ;;  %v1678_v43 = vsel %vm1677_vm3, %v1466_v7, %v1676_v10  ;;  %v1732_v0 = vpop.permute.xlu1 %1731 }
 0x2d2   :  { %v1482_v1 = vadd.f32 %v1481_v58, %v1480_v11  ;;  %v1489_v45 = vadd.f32 %v1488_v34, %v1487_v19  ;;  %v1656_v46 = vadd.f32 %v1655_v41, %v1654_v42  ;;  %v1475_v52 = vadd.f32 %v1474_v13, %v1473_v12  ;;  %v1730_v57 = vpop.permute.xlu0 %1729 }
 0x2d4   :  { %v1483_v35 = vrot.slane %v1482_v1, 1  ;;  %v1490_v50 = vrot.slane %v1489_v45, 2  ;;  %v1657_v44 = vrot.slane %v1656_v46, 4  ;;  %v1680_v3 = vsel %vm1679_vm4, %v1475_v52, %v1678_v43 }
 0x2d6   :  { %v1491_v53 = vadd.f32 %v1490_v50, %v1489_v45  ;;  %v1658_v31 = vadd.f32 %v1657_v44, %v1656_v46  ;;  %v1484_v38 = vadd.f32 %v1483_v35, %v1482_v1 }
 0x2d8   :  { %v1492_v48 = vrot.slane %v1491_v53, 1  ;;  %v1659_v14 = vrot.slane %v1658_v31, 2  ;;  %v1682_v20 = vsel %vm1681_vm5, %v1484_v38, %v1680_v3 }
 0x2da   :  { %v1660_v24 = vadd.f32 %v1659_v14, %v1658_v31  ;;  %v1493_v27 = vadd.f32 %v1492_v48, %v1491_v53 }
 0x2dc   :  { %v1661_v23 = vrot.slane %v1660_v24, 1  ;;  %v1684_v28 = vsel %vm1683_vm6, %v1493_v27, %v1682_v20 }
 0x2dd   :  { %v1711_v55 = vadd.f32 %v1709_v54, %v1684_v28 }
 0x2de   :  { %v1662_v56 = vadd.f32 %v1661_v23, %v1660_v24 }
 0x2df   :  { %v1735_v61 = vmul.f32 %v1730_v57, %v1711_v55 }
 0x2e0   :  { %v1700_v62 = vsel %vm1683_vm6, %v1662_v56, %v2655_v37 }
 0x2e1   :  { %v1712_v63 = vadd.f32 %v1710_v59, %v1700_v62  ;;  %1935 = vmatprep.mubr.msk.f32.mxu0 %vm268_vm10, %v1735_v61 }
 0x2e3   :  { %v1736_v60 = vmul.f32 %v1732_v0, %v1712_v63 }
 0x2e5   :  { %1936 = vmatmul.mubr.msk.f32.vlgmr.msra.gmra.mxu0 %vm268_vm10, %v1736_v60 }
 0x3a5   :  { %v1937_v4 = vpop.f32.mrf.mxu0 }
 0x3a6   :  { %1827 = vst.msk [vmem:[#allocation10 + $0x8] sm:$0xff] %vm67_vm0, %v1937_v4 }
 0x3a7   :  { %v1817_v16 = vpop.f32.mrf.mxu0 }
 0x3a8   :  { %1826 = vst.msk [vmem:[#allocation10] sm:$0xff] %vm67_vm0, %v1817_v16 }
 0x3a9   :  { %2084 = shalt.err (!%p2081_p0)
}
 0x3aa   :  { %1839 = dma.vmem_to_hbm [thread:$0]  %s1834_s25, 256, %s2738_s9, [#allocation7], %s2100_s12, %s2100_s12, %s2101_s13  }
 0x3ab   :  { %2097 = dma.done.wait [#allocation7], 256  }
 0x3ac   :  { %2098 = vsyncadd [#allocation7], 4294967040 }
 0x3ad   :  { %1843 = vsyncpa [#allocation6], 1 }
 0x3ae   :  { %1844 = vsyncpa [#allocation9], 1 }
 0x3af   :  { %1845 = vsyncpa [#allocation7], 1 }

</bundles_post_ra>
